<compile_context>
chip_gen: v7x
topology: tpu7x:2x2x1
jax: 0.10.0
libtpu: 0.0.40
codegen_flags: <defaults>
</compile_context>

<pallas_src>
import math

import jax
import jax.numpy as jnp
from jax.experimental import pallas as pl
from jax.experimental.pallas import tpu as pltpu

_LANE = 128


# ---------------------------------------------------------------------------
# Kernel 1: degradation MLP (runs once per forward, transposed orientation).
# ---------------------------------------------------------------------------
def _deg_mlp_kernel(d_ref, w1_ref, b1_ref, w2_ref, b2_ref, w3_ref, b3_ref,
                    o_ref):
    # W @ d^T keeps output channels on sublanes; f32 operands, f32 accumulate.
    h = jnp.dot(w1_ref[...], d_ref[...],
                preferred_element_type=jnp.float32) + b1_ref[...]    # (320, B)
    h = jnp.maximum(h, 0.0)
    h = jnp.dot(w2_ref[...], h,
                preferred_element_type=jnp.float32) + b2_ref[...]    # (320, B)
    h = jnp.maximum(h, 0.0)
    # b3 already carries '+1' folded into its gamma half -> rows [:C] = 1+gamma.
    o_ref[...] = jnp.dot(w3_ref[...], h,
                         preferred_element_type=jnp.float32) + b3_ref[...]


# ---------------------------------------------------------------------------
# Kernel 2: streaming affine modulation (pure VPU, HBM streaming).
# ---------------------------------------------------------------------------
def _affine_kernel(g_ref, b_ref, x_ref, o_ref):
    # g/b: (BC, 1) lane-broadcast against the (BC, TILE) x block.
    o_ref[...] = g_ref[...] * x_ref[...] + b_ref[...]


# ---------------------------------------------------------------------------
# Wrapper-side helpers.
# ---------------------------------------------------------------------------
def _vmem_budgets():
    """(x_tile_budget_bytes, vmem_limit_bytes), gated by chip generation."""
    try:
        cap = getattr(pltpu.get_tpu_info(), "vmem_capacity_bytes", None)
    except Exception:
        cap = None
    if cap is None:
        return 16 << 20, 40 << 20            # conservative, safe on all gens
    if cap >= (96 << 20):                     # v5e / v6e: 128 MiB physical VMEM
        return 24 << 20, 64 << 20
    return 20 << 20, 44 << 20                 # v7x: 64 MiB physical per TC


def _pick_tile(hw, bc, budget_bytes):
    """Lane-dense spatial tile: multiple of 128, sized so the 4 double-buffered
    f32 (bc, tile) buffers (x-in + out) stay under budget."""
    if hw < _LANE:
        return hw                              # full-extent block (tiny input)
    cap = max(_LANE, (budget_bytes // (16 * bc)) // _LANE * _LANE)
    hw_up = ((hw + _LANE - 1) // _LANE) * _LANE
    return min(hw_up, cap)


def affine_modulate(x, d, params):
    """x: (B, C, H, W) f32, d: (B, 512) f32, params: PyTorch-layout fc weights."""
    B, C, H, W = x.shape
    HW = H * W
    BC = B * C
    x_flat = jnp.asarray(x, jnp.float32).reshape(BC, HW)   # contiguous bitcast
    d_t = jnp.asarray(d, jnp.float32).T                     # (512, B)

    # Weights kept in native PyTorch (out, in) orientation, f32 (matches torch).
    w1 = params["w1"].astype(jnp.float32)                    # (320, 512)
    w2 = params["w2"].astype(jnp.float32)                    # (320, 320)
    w3 = params["w3"].astype(jnp.float32)                    # (2C, 320)
    b1 = params["b1"].astype(jnp.float32).reshape(-1, 1)     # (320, 1)
    b2 = params["b2"].astype(jnp.float32).reshape(-1, 1)     # (320, 1)
    # Fold '+1' into the gamma half of the fc.4 bias.
    b3 = jnp.concatenate([params["b3"][:C] + 1.0,
                          params["b3"][C:]]).astype(jnp.float32).reshape(-1, 1)

    def whole(shape):
        n = len(shape)
        return pl.BlockSpec(shape, lambda i, _n=n: (0,) * _n)

    # --- hoisted degradation MLP: one tiny pallas_call per forward ----------
    gb = pl.pallas_call(
        _deg_mlp_kernel,
        out_shape=jax.ShapeDtypeStruct((2 * C, B), jnp.float32),
        grid=(1,),
        in_specs=[whole(d_t.shape), whole(w1.shape), whole(b1.shape),
                  whole(w2.shape), whole(b2.shape),
                  whole(w3.shape), whole(b3.shape)],
        out_specs=whole((2 * C, B)),
        compiler_params=pltpu.CompilerParams(
            dimension_semantics=("arbitrary",)),
    )(d_t, w1, b1, w2, b2, w3, b3)

    # (2C, B) -> per-(batch, channel) columns matching the (B*C, HW) x layout.
    gamma1 = gb[:C].T.reshape(BC, 1)        # == 1 + gamma
    beta = gb[C:].T.reshape(BC, 1)

    # --- streaming affine modulation ----------------------------------------
    budget, vmem_limit = _vmem_budgets()
    tile = _pick_tile(HW, BC, budget)
    grid = (pl.cdiv(HW, tile),)             # ragged edge masked by Pallas

    out = pl.pallas_call(
        _affine_kernel,
        out_shape=jax.ShapeDtypeStruct((BC, HW), jnp.float32),
        grid=grid,
        in_specs=[
            pl.BlockSpec((BC, 1), lambda t: (0, 0)),       # gamma1 (resident)
            pl.BlockSpec((BC, 1), lambda t: (0, 0)),       # beta   (resident)
            pl.BlockSpec((BC, tile), lambda t: (0, t)),    # x tile (streamed)
        ],
        out_specs=pl.BlockSpec((BC, tile), lambda t: (0, t)),
        compiler_params=pltpu.CompilerParams(
            dimension_semantics=("parallel",),   # v7x: both TCs split the stream
            vmem_limit_bytes=vmem_limit),
    )(gamma1, beta, x_flat)

    return out.reshape(B, C, H, W)


# ---------------------------------------------------------------------------
# Synthetic params + pure-JAX reference.
# ---------------------------------------------------------------------------
def init_params(key, num_feat=64):
    """Deterministic synthetic init mirroring default_init_weights(scale=0.1)."""
    degradation_dim = 512
    hidden = (degradation_dim + num_feat * 2) // 2           # 320 for num_feat=64
    dims = [(hidden, degradation_dim),                       # fc.0: (out, in)
            (hidden, hidden),                                # fc.2
            (num_feat * 2, hidden)]                          # fc.4
    params = {}
    keys = jax.random.split(key, 3)
    for i, ((out_f, in_f), k) in enumerate(zip(dims, keys), start=1):
        # kaiming_normal_ (fan_in, a=0): std = sqrt(2 / fan_in), then *0.1 scale
        std = math.sqrt(2.0 / in_f) * 0.1
        params[f"w{i}"] = std * jax.random.normal(k, (out_f, in_f), jnp.float32)
        params[f"b{i}"] = jnp.zeros((out_f,), jnp.float32)   # bias_fill = 0
    return params


def affine_modulate_ref(x, d, params):
    """Pure-JAX f32 reference matching the PyTorch AffineModulate.forward."""
    h = jnp.maximum(d @ params["w1"].T + params["b1"], 0.0)
    h = jnp.maximum(h @ params["w2"].T + params["b2"], 0.0)
    dd = h @ params["w3"].T + params["b3"]
    C = x.shape[1]
    gamma = dd[:, :C][:, :, None, None]
    beta = dd[:, C:][:, :, None, None]
    return (1.0 + gamma) * x + beta


if __name__ == "__main__":
    key = jax.random.PRNGKey(0)
    k_param, k_x, k_d = jax.random.split(key, 3)

    B, num_feat, H, W = 2, 64, 16, 16
    degradation_dim = 512

    params = init_params(k_param, num_feat=num_feat)
    x = jax.random.normal(k_x, (B, num_feat, H, W), jnp.float32)
    d = jax.random.normal(k_d, (B, degradation_dim), jnp.float32)

    out = jax.block_until_ready(affine_modulate(x, d, params))
    ref = affine_modulate_ref(x, d, params)

    assert out.shape == (B, num_feat, H, W)
    assert jnp.allclose(out, ref, atol=2e-4, rtol=2e-4), "mismatch vs reference"

    print("KERNEL_OK")
</pallas_src>

<mosaic_0001>
module attributes {stable_mosaic.version = 11 : i64} {
  func.func @_deg_mlp_kernel(%arg0: i32, %arg1: memref<512x2xf32, #tpu.memory_space<vmem>>, %arg2: memref<320x512xf32, #tpu.memory_space<vmem>>, %arg3: memref<320x1xf32, #tpu.memory_space<vmem>>, %arg4: memref<320x320xf32, #tpu.memory_space<vmem>>, %arg5: memref<320x1xf32, #tpu.memory_space<vmem>>, %arg6: memref<128x320xf32, #tpu.memory_space<vmem>>, %arg7: memref<128x1xf32, #tpu.memory_space<vmem>>, %arg8: memref<128x2xf32, #tpu.memory_space<vmem>>) attributes {dimension_semantics = [#tpu.dimension_semantics<arbitrary>], iteration_bounds = array<i64: 1>, scalar_prefetch = 0 : i64, scratch_operands = 0 : i64, tpu.core_type = #tpu.core_type<tc>, window_params = [{pipeline_mode = #tpu.pipeline_mode<synchronous>, transform_indices = @transform_0, window_bounds = array<i64: 512, 2>}, {pipeline_mode = #tpu.pipeline_mode<synchronous>, transform_indices = @transform_1, window_bounds = array<i64: 320, 512>}, {pipeline_mode = #tpu.pipeline_mode<synchronous>, transform_indices = @transform_2, window_bounds = array<i64: 320, 1>}, {pipeline_mode = #tpu.pipeline_mode<synchronous>, transform_indices = @transform_3, window_bounds = array<i64: 320, 320>}, {pipeline_mode = #tpu.pipeline_mode<synchronous>, transform_indices = @transform_4, window_bounds = array<i64: 320, 1>}, {pipeline_mode = #tpu.pipeline_mode<synchronous>, transform_indices = @transform_5, window_bounds = array<i64: 128, 320>}, {pipeline_mode = #tpu.pipeline_mode<synchronous>, transform_indices = @transform_6, window_bounds = array<i64: 128, 1>}, {pipeline_mode = #tpu.pipeline_mode<synchronous>, transform_indices = @transform_7, window_bounds = array<i64: 128, 2>}]} {
    %c0 = arith.constant 0 : index
    %c0_0 = arith.constant 0 : index
    %0 = vector.load %arg2[%c0, %c0_0] : memref<320x512xf32, #tpu.memory_space<vmem>>, vector<320x512xf32>
    %c0_1 = arith.constant 0 : index
    %c0_2 = arith.constant 0 : index
    %1 = vector.load %arg1[%c0_1, %c0_2] : memref<512x2xf32, #tpu.memory_space<vmem>>, vector<512x2xf32>
    %cst = arith.constant dense<0.000000e+00> : vector<320x2xf32>
    %2 = tpu.matmul %0, %1, %cst {dimension_numbers = #tpu.dot_dimension_numbers<[1], [0], [0], [1], [0, 0, 1, 1], [], []>} : vector<320x512xf32>, vector<512x2xf32>, vector<320x2xf32> -> vector<320x2xf32>
    %c0_3 = arith.constant 0 : index
    %c0_4 = arith.constant 0 : index
    %3 = vector.load %arg3[%c0_3, %c0_4] : memref<320x1xf32, #tpu.memory_space<vmem>>, vector<320x1xf32>
    %4 = vector.broadcast %3 : vector<320x1xf32> to vector<320x2xf32>
    %5 = arith.addf %2, %4 : vector<320x2xf32>
    %cst_5 = arith.constant 0.000000e+00 : f32
    %6 = vector.broadcast %cst_5 : f32 to vector<320x2xf32>
    %7 = arith.maximumf %5, %6 : vector<320x2xf32>
    %c0_6 = arith.constant 0 : index
    %c0_7 = arith.constant 0 : index
    %8 = vector.load %arg4[%c0_6, %c0_7] : memref<320x320xf32, #tpu.memory_space<vmem>>, vector<320x320xf32>
    %cst_8 = arith.constant dense<0.000000e+00> : vector<320x2xf32>
    %9 = tpu.matmul %8, %7, %cst_8 {dimension_numbers = #tpu.dot_dimension_numbers<[1], [0], [0], [1], [0, 0, 1, 1], [], []>} : vector<320x320xf32>, vector<320x2xf32>, vector<320x2xf32> -> vector<320x2xf32>
    %c0_9 = arith.constant 0 : index
    %c0_10 = arith.constant 0 : index
    %10 = vector.load %arg5[%c0_9, %c0_10] : memref<320x1xf32, #tpu.memory_space<vmem>>, vector<320x1xf32>
    %11 = vector.broadcast %10 : vector<320x1xf32> to vector<320x2xf32>
    %12 = arith.addf %9, %11 : vector<320x2xf32>
    %cst_11 = arith.constant 0.000000e+00 : f32
    %13 = vector.broadcast %cst_11 : f32 to vector<320x2xf32>
    %14 = arith.maximumf %12, %13 : vector<320x2xf32>
    %c0_12 = arith.constant 0 : index
    %c0_13 = arith.constant 0 : index
    %15 = vector.load %arg6[%c0_12, %c0_13] : memref<128x320xf32, #tpu.memory_space<vmem>>, vector<128x320xf32>
    %cst_14 = arith.constant dense<0.000000e+00> : vector<128x2xf32>
    %16 = tpu.matmul %15, %14, %cst_14 {dimension_numbers = #tpu.dot_dimension_numbers<[1], [0], [0], [1], [0, 0, 1, 1], [], []>} : vector<128x320xf32>, vector<320x2xf32>, vector<128x2xf32> -> vector<128x2xf32>
    %c0_15 = arith.constant 0 : index
    %c0_16 = arith.constant 0 : index
    %17 = vector.load %arg7[%c0_15, %c0_16] : memref<128x1xf32, #tpu.memory_space<vmem>>, vector<128x1xf32>
    %18 = vector.broadcast %17 : vector<128x1xf32> to vector<128x2xf32>
    %19 = arith.addf %16, %18 : vector<128x2xf32>
    %c0_17 = arith.constant 0 : index
    %c0_18 = arith.constant 0 : index
    %20 = vector.load %arg8[%c0_17, %c0_18] : memref<128x2xf32, #tpu.memory_space<vmem>>, vector<128x2xf32>
    tpu.vector_store %arg8[%c0_17, %c0_18], %19 {strides = array<i32>} : memref<128x2xf32, #tpu.memory_space<vmem>>, vector<128x2xf32>,
    return
  }
  func.func @transform_0(%arg0: i32) -> (i32, i32) {
    %c0_i32 = arith.constant 0 : i32
    %c0_i32_0 = arith.constant 0 : i32
    %c0_i32_1 = arith.constant 0 : i32
    return %c0_i32, %c0_i32_0 : i32, i32
  }
  func.func @transform_1(%arg0: i32) -> (i32, i32) {
    %c0_i32 = arith.constant 0 : i32
    %c0_i32_0 = arith.constant 0 : i32
    %c0_i32_1 = arith.constant 0 : i32
    return %c0_i32, %c0_i32_0 : i32, i32
  }
  func.func @transform_2(%arg0: i32) -> (i32, i32) {
    %c0_i32 = arith.constant 0 : i32
    %c0_i32_0 = arith.constant 0 : i32
    %c0_i32_1 = arith.constant 0 : i32
    return %c0_i32, %c0_i32_0 : i32, i32
  }
  func.func @transform_3(%arg0: i32) -> (i32, i32) {
    %c0_i32 = arith.constant 0 : i32
    %c0_i32_0 = arith.constant 0 : i32
    %c0_i32_1 = arith.constant 0 : i32
    return %c0_i32, %c0_i32_0 : i32, i32
  }
  func.func @transform_4(%arg0: i32) -> (i32, i32) {
    %c0_i32 = arith.constant 0 : i32
    %c0_i32_0 = arith.constant 0 : i32
    %c0_i32_1 = arith.constant 0 : i32
    return %c0_i32, %c0_i32_0 : i32, i32
  }
  func.func @transform_5(%arg0: i32) -> (i32, i32) {
    %c0_i32 = arith.constant 0 : i32
    %c0_i32_0 = arith.constant 0 : i32
    %c0_i32_1 = arith.constant 0 : i32
    return %c0_i32, %c0_i32_0 : i32, i32
  }
  func.func @transform_6(%arg0: i32) -> (i32, i32) {
    %c0_i32 = arith.constant 0 : i32
    %c0_i32_0 = arith.constant 0 : i32
    %c0_i32_1 = arith.constant 0 : i32
    return %c0_i32, %c0_i32_0 : i32, i32
  }
  func.func @transform_7(%arg0: i32) -> (i32, i32) {
    %c0_i32 = arith.constant 0 : i32
    %c0_i32_0 = arith.constant 0 : i32
    %c0_i32_1 = arith.constant 0 : i32
    return %c0_i32, %c0_i32_0 : i32, i32
  }
}

</mosaic_0001>

<bundles_post_ra>
// kernel: tpu_custom_call.1
= control target key start
LH: loop header
LB: loop body
LE: loop exit
PB: predicated region body
PF: predicated region fallthrough
CT: control target
= control target key end

     0   :  { %12 = vsyncpa [#allocation3], 0  ;;  %s3344_s24 = smov [#allocation2]   ;;  %s4908_s0 = inlined_call_operand.vmem [shape: f32[512,2], index: 0, kind: input, shape index: {}]   ;;  %s4909_s1 = inlined_call_operand.vmem [shape: f32[320,512], index: 1, kind: input, shape index: {}]   ;;  %s4910_s2 = inlined_call_operand.vmem [shape: f32[320,1], index: 2, kind: input, shape index: {}]   ;;  %s4911_s3 = inlined_call_operand.hbm [shape: f32[320,320], index: 3, kind: input, shape index: {}]   ;;  %s4912_s4 = inlined_call_operand.vmem [shape: f32[320,1], index: 4, kind: input, shape index: {}]   ;;  %s4913_s5 = inlined_call_operand.vmem [shape: f32[128,320], index: 5, kind: input, shape index: {}]   ;;  %s4914_s6 = inlined_call_operand.vmem [shape: f32[128,1], index: 6, kind: input, shape index: {}]   ;;  %s4915_s7 = inlined_call_operand.vmem [shape: f32[128,2], index: 7, kind: output, shape index: {}]  }
   0x1   :  { %s24_s25 = sshll.u32 %s3344_s24, 4  ;;  %s3320_s28 = scalar_lea.hbm %s4911_s3, 15360  ;;  %s25_s25 = int_to_ptr.vmem [resolvable:$true] %s24_s25 }
   0x2   :  { %p3321_p0 = scmp.ne.s32.totalorder %s4911_s3, %s3320_s28  ;;  %p3324_p1 = scmp.lt.u32.totalorder %s3320_s28, %s4911_s3 }
   0x4   :  { %p3326_p2 = pnand %p3324_p1, %p3321_p0 }
   0x6   :  { %3329 = shalt.err (!%p3326_p2)
}
   0x7   :  { %s3330_s10 = scalar_lea.vmem %s25_s25, 15360  ;;  %p3335_p4 = scmp.lt.s32.totalorder %s25_s25, %s25_s25 }
   0x8   :  { %p3331_p3 = scmp.ne.s32.totalorder %s25_s25, %s3330_s10  ;;  %p3336_p5 = scmp.lt.s32.totalorder %s3330_s10, %s3330_s10 }
   0xa   :  { %p3337_p6 = por %p3336_p5, %p3335_p4 }
   0xc   :  { %p3338_p7 = pnand %p3337_p6, %p3331_p3 }
   0xe   :  { %3341 = shalt.err (!%p3338_p7)
}
   0xf   :  { %s3345_s11 = smov 384   ;;  %s3346_s12 = smov 24  }
  0x10   :  { %30 = dma.hbm_to_vmem [thread:$0]  %s4911_s3, 15360, %s25_s25, [#allocation3], %s3345_s11, %s3345_s11, %s3346_s12  }
  0x11   :  { %3342 = dma.done.wait [#allocation3], 15360  }
  0x12   :  { %3343 = vsyncadd [#allocation3], 4294951936  ;;  %v3347_v0 = vmov 0.0|0.0   ;;  %v200_v1 = vld [vmem:[%s4908_s0] sm:$0xff]  ;;  %v201_v2 = vld [vmem:[%s4908_s0 + $0x8] sm:$0xff]  ;;  %v3348_v44 = vmov 0  }
  0x13   :  { %2953 = vmatprep.subr.bf16.mxu0 %v3347_v0  ;;  %3161 = vmatprep.subr.bf16.mxu1 %v3347_v0  ;;  %v202_v3 = vld [vmem:[%s4908_s0 + $0x10] sm:$0xff]  ;;  %v2954_v4 = vpack.c.bf16 %v201_v2, %v200_v1  ;;  %v203_v5 = vld [vmem:[%s4908_s0 + $0x18] sm:$0xff]  ;;  %v204_v7 = vld [vmem:[%s4908_s0 + $0x20] sm:$0xff]  ;;  %vm1434_vm0 = vcmask 523264   ;;  %vm2607_vm1 = vcmask 15360  }
  0x14   :  { %v2957_v6 = vpack.c.bf16 %v203_v5, %v202_v3  ;;  %v205_v8 = vld [vmem:[%s4908_s0 + $0x28] sm:$0xff]  ;;  %v206_v10 = vld [vmem:[%s4908_s0 + $0x30] sm:$0xff]  ;;  %v207_v11 = vld [vmem:[%s4908_s0 + $0x38] sm:$0xff]  ;;  %3318 = vset.pattern.permute.xlu0 %v3348_v44  ;;  %3319 = vset.pattern.permute.xlu1 %v3348_v44 }
  0x15   :  { %2955 = vmatpush1.bf16.msra.mxu0 %v2954_v4  ;;  %v2960_v9 = vpack.c.bf16 %v205_v8, %v204_v7  ;;  %v41_v12 = vld [vmem:[%s4909_s1 + $0x8] sm:$0xff]  ;;  %v2963_v13 = vpack.c.bf16 %v207_v11, %v206_v10  ;;  %v208_v14 = vld [vmem:[%s4908_s0 + $0x40] sm:$0xff]  ;;  %v210_v17 = vld [vmem:[%s4908_s0 + $0x50] sm:$0xff] }
  0x16   :  { %2956 = vmatprep.subr.bf16.mxu0 %v3347_v0  ;;  %568 = vmatprep.mubr.f32.mxu0 %v41_v12  ;;  %v209_v15 = vld [vmem:[%s4908_s0 + $0x48] sm:$0xff]  ;;  %v211_v18 = vld [vmem:[%s4908_s0 + $0x58] sm:$0xff]  ;;  %v212_v20 = vld [vmem:[%s4908_s0 + $0x60] sm:$0xff] }
  0x17   :  { %v2966_v16 = vpack.c.bf16 %v209_v15, %v208_v14  ;;  %v2969_v19 = vpack.c.bf16 %v211_v18, %v210_v17  ;;  %v213_v21 = vld [vmem:[%s4908_s0 + $0x68] sm:$0xff]  ;;  %v214_v23 = vld [vmem:[%s4908_s0 + $0x70] sm:$0xff]  ;;  %v215_v24 = vld [vmem:[%s4908_s0 + $0x78] sm:$0xff] }
  0x18   :  { %v2972_v22 = vpack.c.bf16 %v213_v21, %v212_v20  ;;  %v2975_v25 = vpack.c.bf16 %v215_v24, %v214_v23  ;;  %v216_v26 = vld [vmem:[%s4908_s0 + $0x80] sm:$0xff]  ;;  %v217_v27 = vld [vmem:[%s4908_s0 + $0x88] sm:$0xff]  ;;  %v218_v29 = vld [vmem:[%s4908_s0 + $0x90] sm:$0xff] }
  0x19   :  { %2958 = vmatpush1.bf16.msra.mxu0 %v2957_v6  ;;  %v2978_v28 = vpack.c.bf16 %v217_v27, %v216_v26  ;;  %v219_v30 = vld [vmem:[%s4908_s0 + $0x98] sm:$0xff]  ;;  %v220_v32 = vld [vmem:[%s4908_s0 + $0xa0] sm:$0xff]  ;;  %v221_v33 = vld [vmem:[%s4908_s0 + $0xa8] sm:$0xff] }
  0x1a   :  { %2959 = vmatprep.subr.bf16.mxu0 %v3347_v0  ;;  %v2981_v31 = vpack.c.bf16 %v219_v30, %v218_v29  ;;  %v2984_v34 = vpack.c.bf16 %v221_v33, %v220_v32  ;;  %v222_v35 = vld [vmem:[%s4908_s0 + $0xb0] sm:$0xff]  ;;  %v223_v36 = vld [vmem:[%s4908_s0 + $0xb8] sm:$0xff]  ;;  %v224_v38 = vld [vmem:[%s4908_s0 + $0xc0] sm:$0xff] }
  0x1b   :  { %v2987_v37 = vpack.c.bf16 %v223_v36, %v222_v35  ;;  %v225_v39 = vld [vmem:[%s4908_s0 + $0xc8] sm:$0xff]  ;;  %v226_v41 = vld [vmem:[%s4908_s0 + $0xd0] sm:$0xff]  ;;  %v227_v42 = vld [vmem:[%s4908_s0 + $0xd8] sm:$0xff] }
  0x1c   :  { %v2990_v40 = vpack.c.bf16 %v225_v39, %v224_v38  ;;  %v2993_v43 = vpack.c.bf16 %v227_v42, %v226_v41  ;;  %v264_v45 = vld [vmem:[%s4910_s2] sm:$0xff]  ;;  %v229_v47 = vld [vmem:[%s4908_s0 + $0xe8] sm:$0xff]  ;;  %v266_v49 = vld [vmem:[%s4910_s2 + $0x10] sm:$0xff] }
  0x1d   :  { %2961 = vmatpush1.bf16.msra.mxu0 %v2960_v9  ;;  %v228_v46 = vld [vmem:[%s4908_s0 + $0xe0] sm:$0xff]  ;;  %306 = vperm.xlu0 %3318, %v264_v45   ;;  %v230_v50 = vld [vmem:[%s4908_s0 + $0xf0] sm:$0xff]  ;;  %v231_v51 = vld [vmem:[%s4908_s0 + $0xf8] sm:$0xff] }
  0x1e   :  { %2962 = vmatprep.subr.bf16.mxu0 %v3347_v0  ;;  %v2996_v48 = vpack.c.bf16 %v229_v47, %v228_v46  ;;  %316 = vperm.xlu1 %3319, %v266_v49   ;;  %v265_v52 = vld [vmem:[%s4910_s2 + $0x8] sm:$0xff]  ;;  %v2999_v53 = vpack.c.bf16 %v231_v51, %v230_v50  ;;  %v267_v54 = vld [vmem:[%s4910_s2 + $0x18] sm:$0xff]  ;;  %v268_v55 = vld [vmem:[%s4910_s2 + $0x20] sm:$0xff] }
  0x1f   :  { %v232_v56 = vld [vmem:[%s4908_s0 + $0x100] sm:$0xff]  ;;  %v233_v57 = vld [vmem:[%s4908_s0 + $0x108] sm:$0xff]  ;;  %v270_v61 = vld [vmem:[%s4910_s2 + $0x30] sm:$0xff] }
  0x20   :  { %v40_v58 = vld [vmem:[%s4909_s1] sm:$0xff]  ;;  %v3002_v59 = vpack.c.bf16 %v233_v57, %v232_v56  ;;  %v269_v60 = vld [vmem:[%s4910_s2 + $0x28] sm:$0xff]  ;;  %v234_v63 = vld [vmem:[%s4908_s0 + $0x110] sm:$0xff] }
  0x21   :  { %2964 = vmatpush1.bf16.msra.mxu0 %v2963_v13  ;;  %311 = vperm.xlu0 %3318, %v265_v52   ;;  %v45_v62 = vld [vmem:[%s4909_s1 + $0x28] sm:$0xff]  ;;  %v235_v1 = vld [vmem:[%s4908_s0 + $0x118] sm:$0xff]  ;;  %v44_v2 = vld [vmem:[%s4909_s1 + $0x20] sm:$0xff] }
  0x22   :  { %2965 = vmatprep.subr.bf16.mxu0 %v3347_v0  ;;  %321 = vperm.xlu1 %3319, %v267_v54   ;;  %v3005_v3 = vpack.c.bf16 %v235_v1, %v234_v63  ;;  %v271_v4 = vld [vmem:[%s4910_s2 + $0x38] sm:$0xff]  ;;  %v272_v5 = vld [vmem:[%s4910_s2 + $0x40] sm:$0xff]  ;;  %v49_v6 = vld [vmem:[%s4909_s1 + $0x48] sm:$0xff] }
  0x23   :  { %v236_v7 = vld [vmem:[%s4908_s0 + $0x120] sm:$0xff]  ;;  %v237_v8 = vld [vmem:[%s4908_s0 + $0x128] sm:$0xff]  ;;  %v274_v12 = vld [vmem:[%s4910_s2 + $0x50] sm:$0xff] }
  0x24   :  { %v48_v9 = vld [vmem:[%s4909_s1 + $0x40] sm:$0xff]  ;;  %v3008_v10 = vpack.c.bf16 %v237_v8, %v236_v7  ;;  %v273_v11 = vld [vmem:[%s4910_s2 + $0x48] sm:$0xff]  ;;  %v238_v14 = vld [vmem:[%s4908_s0 + $0x130] sm:$0xff] }
  0x25   :  { %2967 = vmatpush1.bf16.msra.mxu0 %v2966_v16  ;;  %326 = vperm.xlu0 %3318, %v268_v55   ;;  %v53_v13 = vld [vmem:[%s4909_s1 + $0x68] sm:$0xff]  ;;  %v239_v15 = vld [vmem:[%s4908_s0 + $0x138] sm:$0xff]  ;;  %v52_v16 = vld [vmem:[%s4909_s1 + $0x60] sm:$0xff] }
  0x26   :  { %2968 = vmatprep.subr.bf16.mxu0 %v3347_v0  ;;  %331 = vperm.xlu1 %3319, %v269_v60   ;;  %v3011_v17 = vpack.c.bf16 %v239_v15, %v238_v14  ;;  %v275_v18 = vld [vmem:[%s4910_s2 + $0x58] sm:$0xff]  ;;  %v57_v20 = vld [vmem:[%s4909_s1 + $0x88] sm:$0xff]  ;;  %v240_v21 = vld [vmem:[%s4908_s0 + $0x140] sm:$0xff] }
  0x27   :  { %v56_v23 = vld [vmem:[%s4909_s1 + $0x80] sm:$0xff]  ;;  %v278_v26 = vld [vmem:[%s4910_s2 + $0x70] sm:$0xff]  ;;  %v61_v27 = vld [vmem:[%s4909_s1 + $0xa8] sm:$0xff] }
  0x28   :  { %v243_v29 = vld [vmem:[%s4908_s0 + $0x158] sm:$0xff]  ;;  %v60_v30 = vld [vmem:[%s4909_s1 + $0xa0] sm:$0xff]  ;;  %v245_v36 = vld [vmem:[%s4908_s0 + $0x168] sm:$0xff] }
  0x29   :  { %2970 = vmatpush1.bf16.msra.mxu0 %v2969_v19  ;;  %336 = vperm.xlu0 %3318, %v270_v61   ;;  %v276_v19 = vld [vmem:[%s4910_s2 + $0x60] sm:$0xff]  ;;  %v279_v32 = vld [vmem:[%s4910_s2 + $0x78] sm:$0xff]  ;;  %v281_v39 = vld [vmem:[%s4910_s2 + $0x88] sm:$0xff] }
  0x2a   :  { %2971 = vmatprep.subr.bf16.mxu0 %v3347_v0  ;;  %341 = vperm.xlu1 %3319, %v271_v4   ;;  %v280_v33 = vld [vmem:[%s4910_s2 + $0x80] sm:$0xff]  ;;  %v69_v41 = vld [vmem:[%s4909_s1 + $0xe8] sm:$0xff]  ;;  %v246_v42 = vld [vmem:[%s4908_s0 + $0x170] sm:$0xff] }
  0x2b   :  { %v244_v35 = vld [vmem:[%s4908_s0 + $0x160] sm:$0xff]  ;;  %v283_v46 = vld [vmem:[%s4910_s2 + $0x98] sm:$0xff]  ;;  %v249_v50 = vld [vmem:[%s4908_s0 + $0x188] sm:$0xff] }
  0x2c   :  { %v3020_v38 = vpack.c.bf16 %v245_v36, %v244_v35  ;;  %v68_v44 = vld [vmem:[%s4909_s1 + $0xe0] sm:$0xff]  ;;  %v286_v54 = vld [vmem:[%s4910_s2 + $0xb0] sm:$0xff]  ;;  %v77_v55 = vld [vmem:[%s4909_s1 + $0x128] sm:$0xff] }
  0x2d   :  { %2973 = vmatpush1.bf16.msra.mxu0 %v2972_v22  ;;  %346 = vperm.xlu0 %3318, %v272_v5   ;;  %v241_v22 = vld [vmem:[%s4908_s0 + $0x148] sm:$0xff]  ;;  %v284_v47 = vld [vmem:[%s4910_s2 + $0xa0] sm:$0xff]  ;;  %v250_v56 = vld [vmem:[%s4908_s0 + $0x190] sm:$0xff] }
  0x2e   :  { %2974 = vmatprep.subr.bf16.mxu0 %v3347_v0  ;;  %351 = vperm.xlu1 %3319, %v273_v11   ;;  %v3014_v24 = vpack.c.bf16 %v241_v22, %v240_v21  ;;  %v248_v49 = vld [vmem:[%s4908_s0 + $0x180] sm:$0xff]  ;;  %v251_v57 = vld [vmem:[%s4908_s0 + $0x198] sm:$0xff]  ;;  %v253_v1 = vld [vmem:[%s4908_s0 + $0x1a8] sm:$0xff] }
  0x2f   :  { %v72_v51 = vld [vmem:[%s4909_s1 + $0x100] sm:$0xff]  ;;  %v3026_v52 = vpack.c.bf16 %v249_v50, %v248_v49  ;;  %v287_v60 = vld [vmem:[%s4910_s2 + $0xb8] sm:$0xff]  ;;  %v289_v4 = vld [vmem:[%s4910_s2 + $0xc8] sm:$0xff] }
  0x30   :  { %v288_v61 = vld [vmem:[%s4910_s2 + $0xc0] sm:$0xff]  ;;  %v290_v5 = vld [vmem:[%s4910_s2 + $0xd0] sm:$0xff]  ;;  %v255_v8 = vld [vmem:[%s4908_s0 + $0x1b8] sm:$0xff] }
  0x31   :  { %2976 = vmatpush1.bf16.msra.mxu0 %v2975_v25  ;;  %356 = vperm.xlu0 %3318, %v274_v12   ;;  %v277_v25 = vld [vmem:[%s4910_s2 + $0x68] sm:$0xff]  ;;  %v252_v63 = vld [vmem:[%s4908_s0 + $0x1a0] sm:$0xff]  ;;  %v254_v7 = vld [vmem:[%s4908_s0 + $0x1b0] sm:$0xff] }
  0x32   :  { %2977 = vmatprep.subr.bf16.mxu0 %v3347_v0  ;;  %361 = vperm.xlu1 %3319, %v275_v18   ;;  %v291_v11 = vld [vmem:[%s4910_s2 + $0xd8] sm:$0xff]  ;;  %v292_v12 = vld [vmem:[%s4910_s2 + $0xe0] sm:$0xff]  ;;  %v257_v15 = vld [vmem:[%s4908_s0 + $0x1c8] sm:$0xff] }
  0x33   :  { %v256_v14 = vld [vmem:[%s4908_s0 + $0x1c0] sm:$0xff]  ;;  %v293_v18 = vld [vmem:[%s4910_s2 + $0xe8] sm:$0xff]  ;;  %v258_v21 = vld [vmem:[%s4908_s0 + $0x1d0] sm:$0xff] }
  0x34   :  { %v259_v22 = vld [vmem:[%s4908_s0 + $0x1d8] sm:$0xff]  ;;  %v262_v35 = vld [vmem:[%s4908_s0 + $0x1f0] sm:$0xff]  ;;  %v113_v49 = vld [vmem:[%s4909_s1 + $0x248] sm:$0xff] }
  0x35   :  { %2979 = vmatpush1.bf16.msra.mxu0 %v2978_v28  ;;  %366 = vperm.xlu0 %3318, %v276_v19   ;;  %v242_v28 = vld [vmem:[%s4908_s0 + $0x150] sm:$0xff]  ;;  %v263_v36 = vld [vmem:[%s4908_s0 + $0x1f8] sm:$0xff]  ;;  %v112_v50 = vld [vmem:[%s4909_s1 + $0x240] sm:$0xff] }
  0x36   :  { %2980 = vmatprep.subr.bf16.mxu0 %v3347_v0  ;;  %371 = vperm.xlu1 %3319, %v277_v25   ;;  %v294_v19 = vld [vmem:[%s4910_s2 + $0xf0] sm:$0xff]  ;;  %v295_v25 = vld [vmem:[%s4910_s2 + $0xf8] sm:$0xff] }
  0x39   :  { %2982 = vmatpush1.bf16.msra.mxu0 %v2981_v31  ;;  %376 = vperm.xlu0 %3318, %v278_v26   ;;  %v3017_v31 = vpack.c.bf16 %v243_v29, %v242_v28  ;;  %v296_v26 = vld [vmem:[%s4910_s2 + $0x100] sm:$0xff]  ;;  %v261_v29 = vld [vmem:[%s4908_s0 + $0x1e8] sm:$0xff] }
  0x3a   :  { %2983 = vmatprep.subr.bf16.mxu0 %v3347_v0  ;;  %381 = vperm.xlu1 %3319, %v279_v32   ;;  %v260_v28 = vld [vmem:[%s4908_s0 + $0x1e0] sm:$0xff]  ;;  %v297_v32 = vld [vmem:[%s4910_s2 + $0x108] sm:$0xff] }
  0x3d   :  { %2985 = vmatpush1.bf16.msra.mxu0 %v2984_v34  ;;  %v65_v34 = vld [vmem:[%s4909_s1 + $0xc8] sm:$0xff]  ;;  %386 = vperm.xlu0 %3318, %v280_v33   ;;  %v298_v33 = vld [vmem:[%s4910_s2 + $0x110] sm:$0xff] }
  0x3e   :  { %2986 = vmatprep.subr.bf16.mxu0 %v3347_v0  ;;  %391 = vperm.xlu1 %3319, %v281_v39   ;;  %v299_v39 = vld [vmem:[%s4910_s2 + $0x118] sm:$0xff] }
  0x41   :  { %2988 = vmatpush1.bf16.msra.mxu0 %v2987_v37  ;;  %v64_v37 = vld [vmem:[%s4909_s1 + $0xc0] sm:$0xff] }
  0x42   :  { %2989 = vmatprep.subr.bf16.mxu0 %v3347_v0  ;;  %401 = vperm.xlu1 %3319, %v283_v46   ;;  %v108_v46 = vld [vmem:[%s4909_s1 + $0x220] sm:$0xff] }
  0x45   :  { %2991 = vmatpush1.bf16.msra.mxu0 %v2990_v40  ;;  %v282_v40 = vld [vmem:[%s4910_s2 + $0x90] sm:$0xff] }
  0x46   :  { %2992 = vmatprep.subr.bf16.mxu0 %v3347_v0  ;;  %396 = vperm.xlu0 %3318, %v282_v40   ;;  %v300_v40 = vld [vmem:[%s4910_s2 + $0x120] sm:$0xff] }
  0x49   :  { %2994 = vmatpush1.bf16.msra.mxu0 %v2993_v43  ;;  %v247_v43 = vld [vmem:[%s4908_s0 + $0x178] sm:$0xff] }
  0x4a   :  { %2995 = vmatprep.subr.bf16.mxu0 %v3347_v0  ;;  %v3023_v45 = vpack.c.bf16 %v247_v43, %v246_v42  ;;  %406 = vperm.xlu0 %3318, %v284_v47   ;;  %v104_v42 = vld [vmem:[%s4909_s1 + $0x200] sm:$0xff]  ;;  %v301_v43 = vld [vmem:[%s4910_s2 + $0x128] sm:$0xff]  ;;  %v303_v47 = vld [vmem:[%s4910_s2 + $0x138] sm:$0xff] }
  0x4d   :  { %2997 = vmatpush1.bf16.msra.mxu0 %v2996_v48  ;;  %v73_v48 = vld [vmem:[%s4909_s1 + $0x108] sm:$0xff] }
  0x4e   :  { %2998 = vmatprep.subr.bf16.mxu0 %v3347_v0  ;;  %416 = vperm.xlu0 %3318, %v286_v54   ;;  %v116_v54 = vld [vmem:[%s4909_s1 + $0x260] sm:$0xff] }
  0x51   :  { %3000 = vmatpush1.bf16.msra.mxu0 %v2999_v53  ;;  %v285_v53 = vld [vmem:[%s4910_s2 + $0xa8] sm:$0xff] }
  0x52   :  { %3001 = vmatprep.subr.bf16.mxu0 %v3347_v0  ;;  %411 = vperm.xlu1 %3319, %v285_v53   ;;  %v117_v53 = vld [vmem:[%s4909_s1 + $0x268] sm:$0xff] }
  0x53   :  { %426 = vperm.xlu0 %3318, %v288_v61   ;;  %v125_v61 = vld [vmem:[%s4909_s1 + $0x2a8] sm:$0xff] }
  0x54   :  { %569 = vmatmul.mubr.f32.vlgmr.msra.gmra.mrb[0].mxu0 %v40_v58  ;;  %v76_v58 = vld [vmem:[%s4909_s1 + $0x120] sm:$0xff] }
  0x55   :  { %573 = vmatprep.mubr.f32.mxu0 %v45_v62  ;;  %3003 = vmatpush1.bf16.msra.mxu0 %v3002_v59  ;;  %v3029_v59 = vpack.c.bf16 %v251_v57, %v250_v56  ;;  %v81_v62 = vld [vmem:[%s4909_s1 + $0x148] sm:$0xff]  ;;  %v1212_v56 = vld [vmem:[%s4912_s4 + $0x90] sm:$0xff] }
  0x56   :  { %3004 = vmatprep.subr.bf16.mxu0 %v3347_v0  ;;  %421 = vperm.xlu1 %3319, %v287_v60   ;;  %v121_v57 = vld [vmem:[%s4909_s1 + $0x288] sm:$0xff]  ;;  %v1196_v60 = vld [vmem:[%s4912_s4 + $0x10] sm:$0xff] }
  0x57   :  { %436 = vperm.xlu0 %3318, %v290_v5   ;;  %v1198_v5 = vld [vmem:[%s4912_s4 + $0x20] sm:$0xff] }
  0x58   :  { %574 = vmatmul.mubr.f32.gmra.mrb[2].mxu0 %v44_v2  ;;  %v80_v2 = vld [vmem:[%s4909_s1 + $0x140] sm:$0xff] }
  0x59   :  { %578 = vmatprep.mubr.f32.mxu0 %v49_v6  ;;  %3006 = vmatpush1.bf16.msra.mxu0 %v3005_v3  ;;  %v3032_v3 = vpack.c.bf16 %v253_v1, %v252_v63  ;;  %v85_v6 = vld [vmem:[%s4909_s1 + $0x168] sm:$0xff]  ;;  %v1197_v63 = vld [vmem:[%s4912_s4 + $0x18] sm:$0xff]  ;;  %v1214_v1 = vld [vmem:[%s4912_s4 + $0xa0] sm:$0xff] }
  0x5a   :  { %3007 = vmatprep.subr.bf16.mxu0 %v3347_v0  ;;  %431 = vperm.xlu1 %3319, %v289_v4   ;;  %v1215_v4 = vld [vmem:[%s4912_s4 + $0xa8] sm:$0xff] }
  0x5b   :  { %446 = vperm.xlu0 %3318, %v292_v12   ;;  %v1217_v12 = vld [vmem:[%s4912_s4 + $0xb8] sm:$0xff] }
  0x5c   :  { %579 = vmatmul.mubr.f32.gmra.mrb[4].mxu0 %v48_v9  ;;  %v84_v9 = vld [vmem:[%s4909_s1 + $0x160] sm:$0xff] }
  0x5d   :  { %583 = vmatprep.mubr.f32.mxu0 %v53_v13  ;;  %3009 = vmatpush1.bf16.msra.mxu0 %v3008_v10  ;;  %v3035_v10 = vpack.c.bf16 %v255_v8, %v254_v7  ;;  %v89_v13 = vld [vmem:[%s4909_s1 + $0x188] sm:$0xff]  ;;  %v132_v7 = vld [vmem:[%s4909_s1 + $0x2e0] sm:$0xff] }
  0x5e   :  { %3010 = vmatprep.subr.bf16.mxu0 %v3347_v0  ;;  %441 = vperm.xlu1 %3319, %v291_v11   ;;  %v1199_v8 = vld [vmem:[%s4912_s4 + $0x28] sm:$0xff]  ;;  %v136_v11 = vld [vmem:[%s4909_s1 + $0x300] sm:$0xff] }
  0x5f   :  { %456 = vperm.xlu0 %3318, %v294_v19   ;;  %v144_v19 = vld [vmem:[%s4909_s1 + $0x340] sm:$0xff] }
  0x60   :  { %584 = vmatmul.mubr.f32.gmra.mrb[6].mxu0 %v52_v16  ;;  %v88_v16 = vld [vmem:[%s4909_s1 + $0x180] sm:$0xff] }
  0x61   :  { %588 = vmatprep.mubr.f32.mxu0 %v57_v20  ;;  %3012 = vmatpush1.bf16.msra.mxu0 %v3011_v17  ;;  %v3038_v17 = vpack.c.bf16 %v257_v15, %v256_v14  ;;  %v93_v20 = vld [vmem:[%s4909_s1 + $0x1a8] sm:$0xff]  ;;  %v140_v15 = vld [vmem:[%s4909_s1 + $0x320] sm:$0xff] }
  0x62   :  { %3013 = vmatprep.subr.bf16.mxu0 %v3347_v0  ;;  %451 = vperm.xlu1 %3319, %v293_v18   ;;  %v141_v14 = vld [vmem:[%s4909_s1 + $0x328] sm:$0xff] }
  0x63   :  { %466 = vperm.xlu0 %3318, %v296_v26   ;;  %v145_v18 = vld [vmem:[%s4909_s1 + $0x348] sm:$0xff] }
  0x64   :  { %589 = vmatmul.mubr.f32.gmra.mrb[8].mxu0 %v56_v23  ;;  %v92_v23 = vld [vmem:[%s4909_s1 + $0x1a0] sm:$0xff]  ;;  %v153_v26 = vld [vmem:[%s4909_s1 + $0x388] sm:$0xff] }
  0x65   :  { %593 = vmatprep.mubr.f32.mxu0 %v61_v27  ;;  %3015 = vmatpush1.bf16.msra.mxu0 %v3014_v24  ;;  %v3041_v24 = vpack.c.bf16 %v259_v22, %v258_v21  ;;  %v97_v27 = vld [vmem:[%s4909_s1 + $0x1c8] sm:$0xff]  ;;  %v1202_v21 = vld [vmem:[%s4912_s4 + $0x40] sm:$0xff] }
  0x66   :  { %3016 = vmatprep.subr.bf16.mxu0 %v3347_v0  ;;  %461 = vperm.xlu1 %3319, %v295_v25   ;;  %v149_v22 = vld [vmem:[%s4909_s1 + $0x368] sm:$0xff]  ;;  %v1220_v25 = vld [vmem:[%s4912_s4 + $0xd0] sm:$0xff] }
  0x67   :  { %476 = vperm.xlu0 %3318, %v298_v33   ;;  %v1222_v33 = vld [vmem:[%s4912_s4 + $0xe0] sm:$0xff] }
  0x68   :  { %594 = vmatmul.mubr.f32.gmra.mrb[10].mxu0 %v60_v30  ;;  %v96_v30 = vld [vmem:[%s4909_s1 + $0x1c0] sm:$0xff] }
  0x69   :  { %598 = vmatprep.mubr.f32.mxu0 %v65_v34  ;;  %3018 = vmatpush1.bf16.msra.mxu0 %v3017_v31  ;;  %v3044_v31 = vpack.c.bf16 %v261_v29, %v260_v28  ;;  %v101_v34 = vld [vmem:[%s4909_s1 + $0x1e8] sm:$0xff]  ;;  %v1221_v28 = vld [vmem:[%s4912_s4 + $0xd8] sm:$0xff]  ;;  %v1204_v29 = vld [vmem:[%s4912_s4 + $0x50] sm:$0xff] }
  0x6a   :  { %3019 = vmatprep.subr.bf16.mxu0 %v3347_v0  ;;  %471 = vperm.xlu1 %3319, %v297_v32   ;;  %v1205_v32 = vld [vmem:[%s4912_s4 + $0x58] sm:$0xff] }
  0x6b   :  { %486 = vperm.xlu0 %3318, %v300_v40   ;;  %v1207_v40 = vld [vmem:[%s4912_s4 + $0x68] sm:$0xff] }
  0x6c   :  { %599 = vmatmul.mubr.f32.gmra.mrb[12].mxu0 %v64_v37  ;;  %v100_v37 = vld [vmem:[%s4909_s1 + $0x1e0] sm:$0xff] }
  0x6d   :  { %603 = vmatprep.mubr.f32.mxu0 %v69_v41  ;;  %3021 = vmatpush1.bf16.msra.mxu0 %v3020_v38  ;;  %v3047_v38 = vpack.c.bf16 %v263_v36, %v262_v35  ;;  %v105_v41 = vld [vmem:[%s4909_s1 + $0x208] sm:$0xff]  ;;  %v160_v35 = vld [vmem:[%s4909_s1 + $0x3c0] sm:$0xff] }
  0x6e   :  { %3022 = vmatprep.subr.bf16.mxu0 %v3347_v0  ;;  %481 = vperm.xlu1 %3319, %v299_v39   ;;  %v1223_v36 = vld [vmem:[%s4912_s4 + $0xe8] sm:$0xff]  ;;  %v164_v39 = vld [vmem:[%s4909_s1 + $0x3e0] sm:$0xff] }
  0x70   :  { %604 = vmatmul.mubr.f32.gmra.mrb[14].mxu0 %v68_v44  ;;  %v302_v44 = vld [vmem:[%s4910_s2 + $0x130] sm:$0xff] }
  0x71   :  { %608 = vmatprep.mubr.f32.mxu0 %v73_v48  ;;  %3024 = vmatpush1.bf16.msra.mxu0 %v3023_v45  ;;  %v109_v45 = vld [vmem:[%s4909_s1 + $0x228] sm:$0xff]  ;;  %v1210_v48 = vld [vmem:[%s4912_s4 + $0x80] sm:$0xff] }
  0x72   :  { %3025 = vmatprep.subr.bf16.mxu0 %v3347_v0  ;;  %491 = vperm.xlu1 %3319, %v301_v43   ;;  %v168_v43 = vld [vmem:[%s4909_s1 + $0x400] sm:$0xff] }
  0x73   :  { %496 = vperm.xlu0 %3318, %v302_v44   ;;  %v1225_v44 = vld [vmem:[%s4912_s4 + $0xf8] sm:$0xff] }
  0x74   :  { %609 = vmatmul.mubr.f32.gmra.mrb[16].mxu0 %v72_v51  ;;  %v1211_v51 = vld [vmem:[%s4912_s4 + $0x88] sm:$0xff] }
  0x75   :  { %613 = vmatprep.mubr.f32.mxu0 %v77_v55  ;;  %3027 = vmatpush1.bf16.msra.mxu0 %v3026_v52  ;;  %v1194_v52 = vld [vmem:[%s4912_s4] sm:$0xff]  ;;  %v1195_v55 = vld [vmem:[%s4912_s4 + $0x8] sm:$0xff] }
  0x76   :  { %3028 = vmatprep.subr.bf16.mxu0 %v3347_v0  ;;  %501 = vperm.xlu1 %3319, %v303_v47   ;;  %v172_v47 = vld [vmem:[%s4909_s1 + $0x420] sm:$0xff] }
  0x77   :  { %1316 = vperm.xlu0 %3318, %v1210_v48   ;;  %v1209_v48 = vld [vmem:[%s4912_s4 + $0x78] sm:$0xff] }
  0x78   :  { %614 = vmatmul.mubr.f32.gmra.mrb[18].mxu0 %v76_v58  ;;  %v120_v58 = vld [vmem:[%s4909_s1 + $0x280] sm:$0xff] }
  0x79   :  { %618 = vmatprep.mubr.f32.mxu0 %v81_v62  ;;  %3030 = vmatpush1.bf16.msra.mxu0 %v3029_v59  ;;  %v1213_v59 = vld [vmem:[%s4912_s4 + $0x98] sm:$0xff]  ;;  %v124_v62 = vld [vmem:[%s4909_s1 + $0x2a0] sm:$0xff] }
  0x7a   :  { %3031 = vmatprep.subr.bf16.mxu0 %v3347_v0  ;;  %1321 = vperm.xlu1 %3319, %v1211_v51   ;;  %v176_v51 = vld [vmem:[%s4909_s1 + $0x440] sm:$0xff] }
  0x7b   :  { %1236 = vperm.xlu0 %3318, %v1194_v52   ;;  %v1227_v52 = vld [vmem:[%s4912_s4 + $0x108] sm:$0xff] }
  0x7c   :  { %619 = vmatmul.mubr.f32.gmra.mrb[20].mxu0 %v80_v2  ;;  %v129_v2 = vld [vmem:[%s4909_s1 + $0x2c8] sm:$0xff] }
  0x7d   :  { %623 = vmatprep.mubr.f32.mxu0 %v85_v6  ;;  %3033 = vmatpush1.bf16.msra.mxu0 %v3032_v3  ;;  %v128_v3 = vld [vmem:[%s4909_s1 + $0x2c0] sm:$0xff]  ;;  %v133_v6 = vld [vmem:[%s4909_s1 + $0x2e8] sm:$0xff] }
  0x7e   :  { %3034 = vmatprep.subr.bf16.mxu0 %v3347_v0  ;;  %1241 = vperm.xlu1 %3319, %v1195_v55   ;;  %v180_v55 = vld [vmem:[%s4909_s1 + $0x460] sm:$0xff] }
  0x7f   :  { %1326 = vperm.xlu0 %3318, %v1212_v56   ;;  %v1229_v56 = vld [vmem:[%s4912_s4 + $0x118] sm:$0xff] }
  0x80   :  { %624 = vmatmul.mubr.f32.gmra.mrb[22].mxu0 %v84_v9  ;;  %v1216_v9 = vld [vmem:[%s4912_s4 + $0xb0] sm:$0xff] }
  0x81   :  { %628 = vmatprep.mubr.f32.mxu0 %v89_v13  ;;  %3036 = vmatpush1.bf16.msra.mxu0 %v3035_v10  ;;  %v137_v10 = vld [vmem:[%s4909_s1 + $0x308] sm:$0xff]  ;;  %v1200_v13 = vld [vmem:[%s4912_s4 + $0x30] sm:$0xff] }
  0x82   :  { %3037 = vmatprep.subr.bf16.mxu0 %v3347_v0  ;;  %1331 = vperm.xlu1 %3319, %v1213_v59   ;;  %v184_v59 = vld [vmem:[%s4909_s1 + $0x480] sm:$0xff] }
  0x83   :  { %1246 = vperm.xlu0 %3318, %v1196_v60   ;;  %v1231_v60 = vld [vmem:[%s4912_s4 + $0x128] sm:$0xff] }
  0x84   :  { %629 = vmatmul.mubr.f32.gmra.mrb[24].mxu0 %v88_v16  ;;  %v1201_v16 = vld [vmem:[%s4912_s4 + $0x38] sm:$0xff] }
  0x85   :  { %633 = vmatprep.mubr.f32.mxu0 %v93_v20  ;;  %3039 = vmatpush1.bf16.msra.mxu0 %v3038_v17  ;;  %v1218_v17 = vld [vmem:[%s4912_s4 + $0xc0] sm:$0xff]  ;;  %v1219_v20 = vld [vmem:[%s4912_s4 + $0xc8] sm:$0xff] }
  0x86   :  { %3040 = vmatprep.subr.bf16.mxu0 %v3347_v0  ;;  %1251 = vperm.xlu1 %3319, %v1197_v63   ;;  %v188_v63 = vld [vmem:[%s4909_s1 + $0x4a0] sm:$0xff] }
  0x87   :  { %1336 = vperm.xlu0 %3318, %v1214_v1   ;;  %v1233_v1 = vld [vmem:[%s4912_s4 + $0x138] sm:$0xff] }
  0x88   :  { %634 = vmatmul.mubr.f32.gmra.mrb[26].mxu0 %v92_v23  ;;  %v148_v23 = vld [vmem:[%s4909_s1 + $0x360] sm:$0xff] }
  0x89   :  { %638 = vmatprep.mubr.f32.mxu0 %v97_v27  ;;  %3042 = vmatpush1.bf16.msra.mxu0 %v3041_v24  ;;  %v1203_v24 = vld [vmem:[%s4912_s4 + $0x48] sm:$0xff]  ;;  %v152_v27 = vld [vmem:[%s4909_s1 + $0x380] sm:$0xff] }
  0x8a   :  { %3043 = vmatprep.subr.bf16.mxu0 %v3347_v0  ;;  %1341 = vperm.xlu1 %3319, %v1215_v4   ;;  %v192_v4 = vld [vmem:[%s4909_s1 + $0x4c0] sm:$0xff] }
  0x8b   :  { %1256 = vperm.xlu0 %3318, %v1198_v5   ;;  %v2174_v5 = vld [vmem:[%s4914_s6 + $0x8] sm:$0xff] }
  0x8c   :  { %639 = vmatmul.mubr.f32.gmra.mrb[28].mxu0 %v96_v30  ;;  %v157_v30 = vld [vmem:[%s4909_s1 + $0x3a8] sm:$0xff] }
  0x8d   :  { %643 = vmatprep.mubr.f32.mxu0 %v101_v34  ;;  %3045 = vmatpush1.bf16.msra.mxu0 %v3044_v31  ;;  %v156_v31 = vld [vmem:[%s4909_s1 + $0x3a0] sm:$0xff]  ;;  %v161_v34 = vld [vmem:[%s4909_s1 + $0x3c8] sm:$0xff] }
  0x8e   :  { %3046 = vmatprep.subr.bf16.mxu0 %v3347_v0  ;;  %1261 = vperm.xlu1 %3319, %v1199_v8   ;;  %v196_v8 = vld [vmem:[%s4909_s1 + $0x4e0] sm:$0xff] }
  0x8f   :  { %1346 = vperm.xlu0 %3318, %v1216_v9   ;;  %v2176_v9 = vld [vmem:[%s4914_s6 + $0x18] sm:$0xff] }
  0x90   :  { %644 = vmatmul.mubr.f32.gmra.mrb[30].mxu0 %v100_v37  ;;  %v1206_v37 = vld [vmem:[%s4912_s4 + $0x60] sm:$0xff] }
  0x91   :  { %648 = vmatprep.mubr.f32.mxu0 %v105_v41  ;;  %3048 = vmatpush1.bf16.msra.mxu0 %v3047_v38  ;;  %v165_v38 = vld [vmem:[%s4909_s1 + $0x3e8] sm:$0xff]  ;;  %v1224_v41 = vld [vmem:[%s4912_s4 + $0xf0] sm:$0xff] }
  0x92   :  { %3049 = vmatprep.subr.bf16.mxu0 %v3347_v0  ;;  %1351 = vperm.xlu1 %3319, %v1217_v12   ;;  %v42_v12 = vld [vmem:[%s4909_s1 + $0x10] sm:$0xff] }
  0x93   :  { %1266 = vperm.xlu0 %3318, %v1200_v13   ;;  %v2178_v13 = vld [vmem:[%s4914_s6 + $0x28] sm:$0xff] }
  0x94   :  { %649 = vmatmul.mubr.f32.gmra.mrb[32].mxu0 %v104_v42  ;;  %v169_v42 = vld [vmem:[%s4909_s1 + $0x408] sm:$0xff] }
  0x95   :  { %653 = vmatprep.mubr.f32.mxu0 %v109_v45  ;;  %v1208_v45 = vld [vmem:[%s4912_s4 + $0x70] sm:$0xff] }
  0x96   :  { %1271 = vperm.xlu1 %3319, %v1201_v16   ;;  %v46_v16 = vld [vmem:[%s4909_s1 + $0x30] sm:$0xff] }
  0x97   :  { %1356 = vperm.xlu0 %3318, %v1218_v17   ;;  %v2180_v17 = vld [vmem:[%s4914_s6 + $0x38] sm:$0xff] }
  0x98   :  { %654 = vmatmul.mubr.f32.gmra.mrb[34].mxu0 %v108_v46  ;;  %v173_v46 = vld [vmem:[%s4909_s1 + $0x428] sm:$0xff] }
  0x99   :  { %658 = vmatprep.mubr.f32.mxu0 %v113_v49  ;;  %v1226_v49 = vld [vmem:[%s4912_s4 + $0x100] sm:$0xff] }
  0x9a   :  { %1361 = vperm.xlu1 %3319, %v1219_v20   ;;  %v50_v20 = vld [vmem:[%s4909_s1 + $0x50] sm:$0xff] }
  0x9b   :  { %1276 = vperm.xlu0 %3318, %v1202_v21   ;;  %v2182_v21 = vld [vmem:[%s4914_s6 + $0x48] sm:$0xff] }
  0x9c   :  { %659 = vmatmul.mubr.f32.gmra.mrb[36].mxu0 %v112_v50  ;;  %v177_v50 = vld [vmem:[%s4909_s1 + $0x448] sm:$0xff] }
  0x9d   :  { %663 = vmatprep.mubr.f32.mxu0 %v117_v53  ;;  %v1228_v53 = vld [vmem:[%s4912_s4 + $0x110] sm:$0xff] }
  0x9e   :  { %1281 = vperm.xlu1 %3319, %v1203_v24   ;;  %v54_v24 = vld [vmem:[%s4909_s1 + $0x70] sm:$0xff] }
  0x9f   :  { %1366 = vperm.xlu0 %3318, %v1220_v25   ;;  %v2184_v25 = vld [vmem:[%s4914_s6 + $0x58] sm:$0xff] }
  0xa0   :  { %664 = vmatmul.mubr.f32.gmra.mrb[38].mxu0 %v116_v54  ;;  %v181_v54 = vld [vmem:[%s4909_s1 + $0x468] sm:$0xff] }
  0xa1   :  { %668 = vmatprep.mubr.f32.mxu0 %v121_v57  ;;  %v1230_v57 = vld [vmem:[%s4912_s4 + $0x120] sm:$0xff] }
  0xa2   :  { %1371 = vperm.xlu1 %3319, %v1221_v28   ;;  %v58_v28 = vld [vmem:[%s4909_s1 + $0x90] sm:$0xff] }
  0xa3   :  { %1286 = vperm.xlu0 %3318, %v1204_v29   ;;  %v2186_v29 = vld [vmem:[%s4914_s6 + $0x68] sm:$0xff] }
  0xa4   :  { %669 = vmatmul.mubr.f32.gmra.mrb[40].mxu0 %v120_v58  ;;  %v185_v58 = vld [vmem:[%s4909_s1 + $0x488] sm:$0xff] }
  0xa5   :  { %673 = vmatprep.mubr.f32.mxu0 %v125_v61  ;;  %v1232_v61 = vld [vmem:[%s4912_s4 + $0x130] sm:$0xff] }
  0xa6   :  { %1291 = vperm.xlu1 %3319, %v1205_v32   ;;  %v62_v32 = vld [vmem:[%s4909_s1 + $0xb0] sm:$0xff] }
  0xa7   :  { %1376 = vperm.xlu0 %3318, %v1222_v33   ;;  %v2188_v33 = vld [vmem:[%s4914_s6 + $0x78] sm:$0xff] }
  0xa8   :  { %674 = vmatmul.mubr.f32.gmra.mrb[42].mxu0 %v124_v62  ;;  %v189_v62 = vld [vmem:[%s4909_s1 + $0x4a8] sm:$0xff] }
  0xa9   :  { %678 = vmatprep.mubr.f32.mxu0 %v129_v2  ;;  %v2173_v2 = vld [vmem:[%s4914_s6] sm:$0xff] }
  0xaa   :  { %1381 = vperm.xlu1 %3319, %v1223_v36   ;;  %v71_v36 = vld [vmem:[%s4909_s1 + $0xf8] sm:$0xff] }
  0xab   :  { %1296 = vperm.xlu0 %3318, %v1206_v37   ;;  %v70_v37 = vld [vmem:[%s4909_s1 + $0xf0] sm:$0xff] }
  0xac   :  { %679 = vmatmul.mubr.f32.gmra.mrb[44].mxu0 %v128_v3  ;;  %v193_v3 = vld [vmem:[%s4909_s1 + $0x4c8] sm:$0xff] }
  0xad   :  { %683 = vmatprep.mubr.f32.mxu0 %v133_v6  ;;  %v2175_v6 = vld [vmem:[%s4914_s6 + $0x10] sm:$0xff] }
  0xae   :  { %1301 = vperm.xlu1 %3319, %v1207_v40   ;;  %v79_v40 = vld [vmem:[%s4909_s1 + $0x138] sm:$0xff] }
  0xaf   :  { %1386 = vperm.xlu0 %3318, %v1224_v41   ;;  %v78_v41 = vld [vmem:[%s4909_s1 + $0x130] sm:$0xff] }
  0xb0   :  { %684 = vmatmul.mubr.f32.gmra.mrb[46].mxu0 %v132_v7  ;;  %v197_v7 = vld [vmem:[%s4909_s1 + $0x4e8] sm:$0xff] }
  0xb1   :  { %688 = vmatprep.mubr.f32.mxu0 %v137_v10  ;;  %v2177_v10 = vld [vmem:[%s4914_s6 + $0x20] sm:$0xff] }
  0xb2   :  { %1391 = vperm.xlu1 %3319, %v1225_v44   ;;  %v87_v44 = vld [vmem:[%s4909_s1 + $0x178] sm:$0xff] }
  0xb3   :  { %1306 = vperm.xlu0 %3318, %v1208_v45   ;;  %v86_v45 = vld [vmem:[%s4909_s1 + $0x170] sm:$0xff] }
  0xb4   :  { %689 = vmatmul.mubr.f32.gmra.mrb[48].mxu0 %v136_v11  ;;  %v43_v11 = vld [vmem:[%s4909_s1 + $0x18] sm:$0xff] }
  0xb5   :  { %693 = vmatprep.mubr.f32.mxu0 %v141_v14  ;;  %v2179_v14 = vld [vmem:[%s4914_s6 + $0x30] sm:$0xff] }
  0xb6   :  { %1311 = vperm.xlu1 %3319, %v1209_v48   ;;  %v95_v48 = vld [vmem:[%s4909_s1 + $0x1b8] sm:$0xff] }
  0xb7   :  { %1396 = vperm.xlu0 %3318, %v1226_v49   ;;  %v94_v49 = vld [vmem:[%s4909_s1 + $0x1b0] sm:$0xff] }
  0xb8   :  { %694 = vmatmul.mubr.f32.gmra.mrb[50].mxu0 %v140_v15  ;;  %v47_v15 = vld [vmem:[%s4909_s1 + $0x38] sm:$0xff] }
  0xb9   :  { %698 = vmatprep.mubr.f32.mxu0 %v145_v18  ;;  %v2181_v18 = vld [vmem:[%s4914_s6 + $0x40] sm:$0xff] }
  0xba   :  { %1401 = vperm.xlu1 %3319, %v1227_v52   ;;  %v103_v52 = vld [vmem:[%s4909_s1 + $0x1f8] sm:$0xff] }
  0xbb   :  { %1406 = vperm.xlu0 %3318, %v1228_v53   ;;  %v102_v53 = vld [vmem:[%s4909_s1 + $0x1f0] sm:$0xff] }
  0xbc   :  { %699 = vmatmul.mubr.f32.gmra.mrb[52].mxu0 %v144_v19  ;;  %v51_v19 = vld [vmem:[%s4909_s1 + $0x58] sm:$0xff] }
  0xbd   :  { %703 = vmatprep.mubr.f32.mxu0 %v149_v22  ;;  %v2183_v22 = vld [vmem:[%s4914_s6 + $0x50] sm:$0xff] }
  0xbe   :  { %1411 = vperm.xlu1 %3319, %v1229_v56   ;;  %v111_v56 = vld [vmem:[%s4909_s1 + $0x238] sm:$0xff] }
  0xbf   :  { %1416 = vperm.xlu0 %3318, %v1230_v57   ;;  %v110_v57 = vld [vmem:[%s4909_s1 + $0x230] sm:$0xff] }
  0xc0   :  { %704 = vmatmul.mubr.f32.gmra.mrb[54].mxu0 %v148_v23  ;;  %v55_v23 = vld [vmem:[%s4909_s1 + $0x78] sm:$0xff] }
  0xc1   :  { %708 = vmatprep.mubr.f32.mxu0 %v153_v26  ;;  %v2185_v26 = vld [vmem:[%s4914_s6 + $0x60] sm:$0xff] }
  0xc2   :  { %1421 = vperm.xlu1 %3319, %v1231_v60   ;;  %v119_v60 = vld [vmem:[%s4909_s1 + $0x278] sm:$0xff] }
  0xc3   :  { %1426 = vperm.xlu0 %3318, %v1232_v61   ;;  %v118_v61 = vld [vmem:[%s4909_s1 + $0x270] sm:$0xff] }
  0xc4   :  { %709 = vmatmul.mubr.f32.gmra.mrb[56].mxu0 %v152_v27  ;;  %v59_v27 = vld [vmem:[%s4909_s1 + $0x98] sm:$0xff] }
  0xc5   :  { %713 = vmatprep.mubr.f32.mxu0 %v157_v30  ;;  %v2187_v30 = vld [vmem:[%s4914_s6 + $0x70] sm:$0xff] }
  0xc6   :  { %1431 = vperm.xlu1 %3319, %v1233_v1   ;;  %v127_v1 = vld [vmem:[%s4909_s1 + $0x2b8] sm:$0xff] }
  0xc7   :  { %2191 = vperm.xlu0 %3318, %v2173_v2   ;;  %v126_v2 = vld [vmem:[%s4909_s1 + $0x2b0] sm:$0xff] }
  0xc8   :  { %714 = vmatmul.mubr.f32.gmra.mrb[58].mxu0 %v156_v31  ;;  %v63_v31 = vld [vmem:[%s4909_s1 + $0xb8] sm:$0xff] }
  0xc9   :  { %718 = vmatprep.mubr.f32.mxu0 %v161_v34  ;;  %v67_v34 = vld [vmem:[%s4909_s1 + $0xd8] sm:$0xff] }
  0xca   :  { %2196 = vperm.xlu1 %3319, %v2174_v5   ;;  %v135_v5 = vld [vmem:[%s4909_s1 + $0x2f8] sm:$0xff] }
  0xcb   :  { %2201 = vperm.xlu0 %3318, %v2175_v6   ;;  %v134_v6 = vld [vmem:[%s4909_s1 + $0x2f0] sm:$0xff] }
  0xcc   :  { %719 = vmatmul.mubr.f32.gmra.mrb[60].mxu0 %v160_v35  ;;  %v66_v35 = vld [vmem:[%s4909_s1 + $0xd0] sm:$0xff] }
  0xcd   :  { %723 = vmatprep.mubr.f32.mxu0 %v165_v38  ;;  %v75_v38 = vld [vmem:[%s4909_s1 + $0x118] sm:$0xff] }
  0xce   :  { %2206 = vperm.xlu1 %3319, %v2176_v9   ;;  %v143_v9 = vld [vmem:[%s4909_s1 + $0x338] sm:$0xff] }
  0xcf   :  { %2211 = vperm.xlu0 %3318, %v2177_v10   ;;  %v142_v10 = vld [vmem:[%s4909_s1 + $0x330] sm:$0xff] }
  0xd0   :  { %724 = vmatmul.mubr.f32.gmra.mrb[62].mxu0 %v164_v39  ;;  %v74_v39 = vld [vmem:[%s4909_s1 + $0x110] sm:$0xff] }
  0xd1   :  { %728 = vmatprep.mubr.f32.mxu0 %v169_v42  ;;  %v83_v42 = vld [vmem:[%s4909_s1 + $0x158] sm:$0xff] }
  0xd2   :  { %2216 = vperm.xlu1 %3319, %v2178_v13   ;;  %v151_v13 = vld [vmem:[%s4909_s1 + $0x378] sm:$0xff] }
  0xd3   :  { %2221 = vperm.xlu0 %3318, %v2179_v14   ;;  %v150_v14 = vld [vmem:[%s4909_s1 + $0x370] sm:$0xff] }
  0xd4   :  { %729 = vmatmul.mubr.f32.gmra.mrb[64].mxu0 %v168_v43  ;;  %v82_v43 = vld [vmem:[%s4909_s1 + $0x150] sm:$0xff] }
  0xd5   :  { %733 = vmatprep.mubr.f32.mxu0 %v173_v46  ;;  %v91_v46 = vld [vmem:[%s4909_s1 + $0x198] sm:$0xff] }
  0xd6   :  { %2226 = vperm.xlu1 %3319, %v2180_v17   ;;  %v159_v17 = vld [vmem:[%s4909_s1 + $0x3b8] sm:$0xff] }
  0xd7   :  { %2231 = vperm.xlu0 %3318, %v2181_v18   ;;  %v158_v18 = vld [vmem:[%s4909_s1 + $0x3b0] sm:$0xff] }
  0xd8   :  { %734 = vmatmul.mubr.f32.gmra.mrb[66].mxu0 %v172_v47  ;;  %v90_v47 = vld [vmem:[%s4909_s1 + $0x190] sm:$0xff] }
  0xd9   :  { %738 = vmatprep.mubr.f32.mxu0 %v177_v50  ;;  %v99_v50 = vld [vmem:[%s4909_s1 + $0x1d8] sm:$0xff] }
  0xda   :  { %2236 = vperm.xlu1 %3319, %v2182_v21   ;;  %v167_v21 = vld [vmem:[%s4909_s1 + $0x3f8] sm:$0xff] }
  0xdb   :  { %2241 = vperm.xlu0 %3318, %v2183_v22   ;;  %v166_v22 = vld [vmem:[%s4909_s1 + $0x3f0] sm:$0xff] }
  0xdc   :  { %739 = vmatmul.mubr.f32.gmra.mrb[68].mxu0 %v176_v51  ;;  %v98_v51 = vld [vmem:[%s4909_s1 + $0x1d0] sm:$0xff] }
  0xdd   :  { %743 = vmatprep.mubr.f32.mxu0 %v181_v54  ;;  %v107_v54 = vld [vmem:[%s4909_s1 + $0x218] sm:$0xff] }
  0xde   :  { %2246 = vperm.xlu1 %3319, %v2184_v25   ;;  %v175_v25 = vld [vmem:[%s4909_s1 + $0x438] sm:$0xff] }
  0xdf   :  { %2251 = vperm.xlu0 %3318, %v2185_v26   ;;  %v174_v26 = vld [vmem:[%s4909_s1 + $0x430] sm:$0xff] }
  0xe0   :  { %744 = vmatmul.mubr.f32.gmra.mrb[70].mxu0 %v180_v55  ;;  %v106_v55 = vld [vmem:[%s4909_s1 + $0x210] sm:$0xff] }
  0xe1   :  { %748 = vmatprep.mubr.f32.mxu0 %v185_v58  ;;  %v115_v58 = vld [vmem:[%s4909_s1 + $0x258] sm:$0xff] }
  0xe2   :  { %2256 = vperm.xlu1 %3319, %v2186_v29   ;;  %v183_v29 = vld [vmem:[%s4909_s1 + $0x478] sm:$0xff] }
  0xe3   :  { %2261 = vperm.xlu0 %3318, %v2187_v30   ;;  %v182_v30 = vld [vmem:[%s4909_s1 + $0x470] sm:$0xff] }
  0xe4   :  { %749 = vmatmul.mubr.f32.gmra.mrb[72].mxu0 %v184_v59  ;;  %v114_v59 = vld [vmem:[%s4909_s1 + $0x250] sm:$0xff] }
  0xe5   :  { %753 = vmatprep.mubr.f32.mxu0 %v189_v62  ;;  %v123_v62 = vld [vmem:[%s4909_s1 + $0x298] sm:$0xff] }
  0xe6   :  { %2266 = vperm.xlu1 %3319, %v2188_v33   ;;  %v191_v33 = vld [vmem:[%s4909_s1 + $0x4b8] sm:$0xff] }
  0xe8   :  { %754 = vmatmul.mubr.f32.gmra.mrb[74].mxu0 %v188_v63  ;;  %v122_v63 = vld [vmem:[%s4909_s1 + $0x290] sm:$0xff] }
  0xe9   :  { %758 = vmatprep.mubr.f32.mxu0 %v193_v3  ;;  %v131_v3 = vld [vmem:[%s4909_s1 + $0x2d8] sm:$0xff] }
  0xec   :  { %759 = vmatmul.mubr.f32.gmra.mrb[76].mxu0 %v192_v4  ;;  %v130_v4 = vld [vmem:[%s4909_s1 + $0x2d0] sm:$0xff] }
  0xed   :  { %763 = vmatprep.mubr.f32.mxu0 %v197_v7  ;;  %v139_v7 = vld [vmem:[%s4909_s1 + $0x318] sm:$0xff] }
  0xf0   :  { %764 = vmatmul.mubr.f32.gmra.mrb[78].mxu0 %v196_v8  ;;  %v138_v8 = vld [vmem:[%s4909_s1 + $0x310] sm:$0xff] }
  0xf1   :  { %833 = vmatprep.mubr.f32.mxu0 %v43_v11  ;;  %v147_v11 = vld [vmem:[%s4909_s1 + $0x358] sm:$0xff] }
  0xf4   :  { %834 = vmatmul.mubr.f32.vlgmr.msra.gmra.mrb[0].mxu0 %v42_v12  ;;  %v146_v12 = vld [vmem:[%s4909_s1 + $0x350] sm:$0xff] }
  0xf5   :  { %838 = vmatprep.mubr.f32.mxu0 %v47_v15  ;;  %v155_v15 = vld [vmem:[%s4909_s1 + $0x398] sm:$0xff] }
  0xf8   :  { %839 = vmatmul.mubr.f32.gmra.mrb[2].mxu0 %v46_v16  ;;  %v154_v16 = vld [vmem:[%s4909_s1 + $0x390] sm:$0xff] }
  0xf9   :  { %843 = vmatprep.mubr.f32.mxu0 %v51_v19  ;;  %v163_v19 = vld [vmem:[%s4909_s1 + $0x3d8] sm:$0xff] }
  0xfc   :  { %844 = vmatmul.mubr.f32.gmra.mrb[4].mxu0 %v50_v20  ;;  %v162_v20 = vld [vmem:[%s4909_s1 + $0x3d0] sm:$0xff] }
  0xfd   :  { %848 = vmatprep.mubr.f32.mxu0 %v55_v23  ;;  %v171_v23 = vld [vmem:[%s4909_s1 + $0x418] sm:$0xff] }
 0x100   :  { %849 = vmatmul.mubr.f32.gmra.mrb[6].mxu0 %v54_v24  ;;  %v170_v24 = vld [vmem:[%s4909_s1 + $0x410] sm:$0xff] }
 0x101   :  { %853 = vmatprep.mubr.f32.mxu0 %v59_v27  ;;  %v179_v27 = vld [vmem:[%s4909_s1 + $0x458] sm:$0xff] }
 0x104   :  { %854 = vmatmul.mubr.f32.gmra.mrb[8].mxu0 %v58_v28  ;;  %v178_v28 = vld [vmem:[%s4909_s1 + $0x450] sm:$0xff] }
 0x105   :  { %858 = vmatprep.mubr.f32.mxu0 %v63_v31  ;;  %v187_v31 = vld [vmem:[%s4909_s1 + $0x498] sm:$0xff] }
 0x108   :  { %859 = vmatmul.mubr.f32.gmra.mrb[10].mxu0 %v62_v32  ;;  %v186_v32 = vld [vmem:[%s4909_s1 + $0x490] sm:$0xff] }
 0x109   :  { %863 = vmatprep.mubr.f32.mxu0 %v67_v34  ;;  %v190_v34 = vld [vmem:[%s4909_s1 + $0x4b0] sm:$0xff] }
 0x10c   :  { %864 = vmatmul.mubr.f32.gmra.mrb[12].mxu0 %v66_v35  ;;  %v195_v35 = vld [vmem:[%s4909_s1 + $0x4d8] sm:$0xff] }
 0x10d   :  { %868 = vmatprep.mubr.f32.mxu0 %v71_v36  ;;  %v194_v36 = vld [vmem:[%s4909_s1 + $0x4d0] sm:$0xff] }
 0x110   :  { %869 = vmatmul.mubr.f32.gmra.mrb[14].mxu0 %v70_v37  ;;  %v199_v37 = vld [vmem:[%s4909_s1 + $0x4f8] sm:$0xff] }
 0x111   :  { %873 = vmatprep.mubr.f32.mxu0 %v75_v38  ;;  %v198_v38 = vld [vmem:[%s4909_s1 + $0x4f0] sm:$0xff] }
 0x114   :  { %874 = vmatmul.mubr.f32.gmra.mrb[16].mxu0 %v74_v39  ;;  %v307_v39 = vpop.permute.xlu0 %306 }
 0x115   :  { %878 = vmatprep.mubr.f32.mxu0 %v79_v40 }
 0x118   :  { %879 = vmatmul.mubr.f32.gmra.mrb[18].mxu0 %v78_v41 }
 0x119   :  { %883 = vmatprep.mubr.f32.mxu0 %v83_v42 }
 0x11c   :  { %884 = vmatmul.mubr.f32.gmra.mrb[20].mxu0 %v82_v43  ;;  %v312_v43 = vpop.permute.xlu0 %311 }
 0x11d   :  { %888 = vmatprep.mubr.f32.mxu0 %v87_v44 }
 0x120   :  { %889 = vmatmul.mubr.f32.gmra.mrb[22].mxu0 %v86_v45  ;;  %v1075_v45 = vld [vmem:[#allocation2 + $0x8] sm:$0xff] }
 0x121   :  { %893 = vmatprep.mubr.f32.mxu0 %v91_v46  ;;  %v1081_v46 = vld [vmem:[#allocation2 + $0x38] sm:$0xff] }
 0x122   :  { %1629 = vmatprep.mubr.f32.mxu1 %v1081_v46 }
 0x124   :  { %894 = vmatmul.mubr.f32.gmra.mrb[24].mxu0 %v90_v47 }
 0x125   :  { %898 = vmatprep.mubr.f32.mxu0 %v95_v48 }
 0x128   :  { %899 = vmatmul.mubr.f32.gmra.mrb[26].mxu0 %v94_v49  ;;  %v317_v49 = vpop.permute.xlu1 %316 }
 0x129   :  { %903 = vmatprep.mubr.f32.mxu0 %v99_v50 }
 0x12c   :  { %904 = vmatmul.mubr.f32.gmra.mrb[28].mxu0 %v98_v51 }
 0x12d   :  { %908 = vmatprep.mubr.f32.mxu0 %v103_v52 }
 0x130   :  { %909 = vmatmul.mubr.f32.gmra.mrb[30].mxu0 %v102_v53 }
 0x131   :  { %913 = vmatprep.mubr.f32.mxu0 %v107_v54 }
 0x134   :  { %914 = vmatmul.mubr.f32.gmra.mrb[32].mxu0 %v106_v55 }
 0x135   :  { %918 = vmatprep.mubr.f32.mxu0 %v111_v56  ;;  %v322_v56 = vpop.permute.xlu1 %321 }
 0x138   :  { %919 = vmatmul.mubr.f32.gmra.mrb[34].mxu0 %v110_v57 }
 0x139   :  { %923 = vmatprep.mubr.f32.mxu0 %v115_v58 }
 0x13c   :  { %924 = vmatmul.mubr.f32.gmra.mrb[36].mxu0 %v114_v59 }
 0x13d   :  { %928 = vmatprep.mubr.f32.mxu0 %v119_v60 }
 0x140   :  { %929 = vmatmul.mubr.f32.gmra.mrb[38].mxu0 %v118_v61 }
 0x141   :  { %933 = vmatprep.mubr.f32.mxu0 %v123_v62 }
 0x144   :  { %934 = vmatmul.mubr.f32.gmra.mrb[40].mxu0 %v122_v63 }
 0x145   :  { %938 = vmatprep.mubr.f32.mxu0 %v127_v1 }
 0x148   :  { %939 = vmatmul.mubr.f32.gmra.mrb[42].mxu0 %v126_v2  ;;  %v327_v2 = vpop.permute.xlu0 %326 }
 0x149   :  { %943 = vmatprep.mubr.f32.mxu0 %v131_v3 }
 0x14c   :  { %944 = vmatmul.mubr.f32.gmra.mrb[44].mxu0 %v130_v4  ;;  %v332_v4 = vpop.permute.xlu1 %331 }
 0x14d   :  { %948 = vmatprep.mubr.f32.mxu0 %v135_v5 }
 0x150   :  { %949 = vmatmul.mubr.f32.gmra.mrb[46].mxu0 %v134_v6 }
 0x151   :  { %953 = vmatprep.mubr.f32.mxu0 %v139_v7 }
 0x154   :  { %954 = vmatmul.mubr.f32.gmra.mrb[48].mxu0 %v138_v8 }
 0x155   :  { %958 = vmatprep.mubr.f32.mxu0 %v143_v9 }
 0x158   :  { %959 = vmatmul.mubr.f32.gmra.mrb[50].mxu0 %v142_v10 }
 0x159   :  { %963 = vmatprep.mubr.f32.mxu0 %v147_v11 }
 0x15c   :  { %964 = vmatmul.mubr.f32.gmra.mrb[52].mxu0 %v146_v12 }
 0x15d   :  { %968 = vmatprep.mubr.f32.mxu0 %v151_v13  ;;  %v337_v13 = vpop.permute.xlu0 %336 }
 0x160   :  { %969 = vmatmul.mubr.f32.gmra.mrb[54].mxu0 %v150_v14 }
 0x161   :  { %973 = vmatprep.mubr.f32.mxu0 %v155_v15  ;;  %v342_v15 = vpop.permute.xlu1 %341 }
 0x164   :  { %974 = vmatmul.mubr.f32.gmra.mrb[56].mxu0 %v154_v16 }
 0x165   :  { %978 = vmatprep.mubr.f32.mxu0 %v159_v17 }
 0x168   :  { %979 = vmatmul.mubr.f32.gmra.mrb[58].mxu0 %v158_v18 }
 0x169   :  { %983 = vmatprep.mubr.f32.mxu0 %v163_v19 }
 0x16c   :  { %984 = vmatmul.mubr.f32.gmra.mrb[60].mxu0 %v162_v20 }
 0x16d   :  { %988 = vmatprep.mubr.f32.mxu0 %v167_v21 }
 0x170   :  { %989 = vmatmul.mubr.f32.gmra.mrb[62].mxu0 %v166_v22 }
 0x171   :  { %993 = vmatprep.mubr.f32.mxu0 %v171_v23 }
 0x174   :  { %994 = vmatmul.mubr.f32.gmra.mrb[64].mxu0 %v170_v24  ;;  %v347_v24 = vpop.permute.xlu0 %346 }
 0x175   :  { %998 = vmatprep.mubr.f32.mxu0 %v175_v25 }
 0x178   :  { %999 = vmatmul.mubr.f32.gmra.mrb[66].mxu0 %v174_v26  ;;  %v352_v26 = vpop.permute.xlu1 %351 }
 0x179   :  { %1003 = vmatprep.mubr.f32.mxu0 %v179_v27 }
 0x17c   :  { %1004 = vmatmul.mubr.f32.gmra.mrb[68].mxu0 %v178_v28 }
 0x17d   :  { %1008 = vmatprep.mubr.f32.mxu0 %v183_v29 }
 0x180   :  { %1009 = vmatmul.mubr.f32.gmra.mrb[70].mxu0 %v182_v30 }
 0x181   :  { %1013 = vmatprep.mubr.f32.mxu0 %v187_v31 }
 0x184   :  { %1014 = vmatmul.mubr.f32.gmra.mrb[72].mxu0 %v186_v32 }
 0x185   :  { %1018 = vmatprep.mubr.f32.mxu0 %v191_v33 }
 0x188   :  { %1019 = vmatmul.mubr.f32.gmra.mrb[74].mxu0 %v190_v34 }
 0x189   :  { %1023 = vmatprep.mubr.f32.mxu0 %v195_v35  ;;  %v357_v35 = vpop.permute.xlu0 %356 }
 0x18c   :  { %1024 = vmatmul.mubr.f32.gmra.mrb[76].mxu0 %v194_v36 }
 0x18d   :  { %1028 = vmatprep.mubr.f32.mxu0 %v199_v37  ;;  %v362_v37 = vpop.permute.xlu1 %361  ;;  %v367_v46 = vpop.permute.xlu0 %366 }
 0x190   :  { %1029 = vmatmul.mubr.f32.gmra.mrb[78].mxu0 %v198_v38 }
 0x191   :  { %1619 = vmatprep.mubr.f32.mxu0 %v1075_v45 }
 0x1c7   :  { %v835_v40 = vpop.f32.mrb[0].mxu0 }
 0x1c8   :  { %v837_v41 = vpop.f32.mrb[1].mxu0  ;;  %v3193_v42 = vadd.f32 %v835_v40, %v307_v39 }
 0x1ca   :  { %v1034_v50 = vmax.f32 %v3193_v42, 0.0 }
 0x1cb   :  { %v840_v44 = vpop.f32.mrb[2].mxu0 }
 0x1cc   :  { %v3194_v47 = vadd.f32 %v840_v44, %v312_v43  ;;  %v842_v48 = vpop.f32.mrb[3].mxu0 }
 0x1cd   :  { %v372_v48 = vpop.permute.xlu1 %371 }
 0x1ce   :  { %v1035_v51 = vmax.f32 %v3194_v47, 0.0 }
 0x1cf   :  { %v845_v52 = vpop.f32.mrb[4].mxu0 }
 0x1d0   :  { %v3050_v53 = vpack.c.bf16 %v1035_v51, %v1034_v50  ;;  %v847_v54 = vpop.f32.mrb[5].mxu0  ;;  %v3195_v55 = vadd.f32 %v845_v52, %v317_v49 }
 0x1d2   :  { %3051 = vmatpush1.bf16.msra.mxu0 %v3050_v53  ;;  %3177 = vmatpush1.bf16.msra.mxu1 %v3050_v53  ;;  %v1036_v60 = vmax.f32 %v3195_v55, 0.0 }
 0x1d3   :  { %v850_v57 = vpop.f32.mrb[6].mxu0  ;;  %3052 = vmatprep.subr.bf16.mxu0 %v3347_v0  ;;  %3162 = vmatprep.subr.bf16.mxu1 %v3347_v0 }
 0x1d4   :  { %v3196_v58 = vadd.f32 %v850_v57, %v322_v56  ;;  %v852_v59 = vpop.f32.mrb[7].mxu0  ;;  %v377_v57 = vpop.permute.xlu0 %376 }
 0x1d5   :  { %v382_v59 = vpop.permute.xlu1 %381 }
 0x1d6   :  { %v1037_v61 = vmax.f32 %v3196_v58, 0.0 }
 0x1d7   :  { %v855_v62 = vpop.f32.mrb[8].mxu0 }
 0x1d8   :  { %v3053_v63 = vpack.c.bf16 %v1037_v61, %v1036_v60  ;;  %v857_v1 = vpop.f32.mrb[9].mxu0  ;;  %v3197_v3 = vadd.f32 %v855_v62, %v327_v2 }
 0x1da   :  { %3054 = vmatpush1.bf16.msra.mxu0 %v3053_v63  ;;  %3178 = vmatpush1.bf16.msra.mxu1 %v3053_v63  ;;  %v1038_v8 = vmax.f32 %v3197_v3, 0.0 }
 0x1db   :  { %v860_v5 = vpop.f32.mrb[10].mxu0  ;;  %3055 = vmatprep.subr.bf16.mxu0 %v3347_v0  ;;  %3163 = vmatprep.subr.bf16.mxu1 %v3347_v0 }
 0x1dc   :  { %v3198_v6 = vadd.f32 %v860_v5, %v332_v4  ;;  %v862_v7 = vpop.f32.mrb[11].mxu0  ;;  %v387_v5 = vpop.permute.xlu0 %386 }
 0x1dd   :  { %v392_v7 = vpop.permute.xlu1 %391 }
 0x1de   :  { %v1039_v9 = vmax.f32 %v3198_v6, 0.0 }
 0x1df   :  { %v865_v10 = vpop.f32.mrb[12].mxu0 }
 0x1e0   :  { %v3056_v11 = vpack.c.bf16 %v1039_v9, %v1038_v8  ;;  %v867_v12 = vpop.f32.mrb[13].mxu0  ;;  %v3199_v14 = vadd.f32 %v865_v10, %v337_v13 }
 0x1e2   :  { %3057 = vmatpush1.bf16.msra.mxu0 %v3056_v11  ;;  %3179 = vmatpush1.bf16.msra.mxu1 %v3056_v11  ;;  %v1040_v19 = vmax.f32 %v3199_v14, 0.0 }
 0x1e3   :  { %v870_v16 = vpop.f32.mrb[14].mxu0  ;;  %3058 = vmatprep.subr.bf16.mxu0 %v3347_v0  ;;  %3164 = vmatprep.subr.bf16.mxu1 %v3347_v0 }
 0x1e4   :  { %v3200_v17 = vadd.f32 %v870_v16, %v342_v15  ;;  %v872_v18 = vpop.f32.mrb[15].mxu0  ;;  %v397_v16 = vpop.permute.xlu0 %396 }
 0x1e5   :  { %v402_v18 = vpop.permute.xlu1 %401 }
 0x1e6   :  { %v1041_v20 = vmax.f32 %v3200_v17, 0.0 }
 0x1e7   :  { %v875_v21 = vpop.f32.mrb[16].mxu0 }
 0x1e8   :  { %v3059_v22 = vpack.c.bf16 %v1041_v20, %v1040_v19  ;;  %v877_v23 = vpop.f32.mrb[17].mxu0  ;;  %v3201_v25 = vadd.f32 %v875_v21, %v347_v24 }
 0x1ea   :  { %3060 = vmatpush1.bf16.msra.mxu0 %v3059_v22  ;;  %3180 = vmatpush1.bf16.msra.mxu1 %v3059_v22  ;;  %v1042_v30 = vmax.f32 %v3201_v25, 0.0 }
 0x1eb   :  { %v880_v27 = vpop.f32.mrb[18].mxu0  ;;  %3061 = vmatprep.subr.bf16.mxu0 %v3347_v0  ;;  %3165 = vmatprep.subr.bf16.mxu1 %v3347_v0 }
 0x1ec   :  { %v3202_v28 = vadd.f32 %v880_v27, %v352_v26  ;;  %v882_v29 = vpop.f32.mrb[19].mxu0  ;;  %v407_v27 = vpop.permute.xlu0 %406 }
 0x1ed   :  { %v412_v29 = vpop.permute.xlu1 %411 }
 0x1ee   :  { %v1043_v31 = vmax.f32 %v3202_v28, 0.0 }
 0x1ef   :  { %v885_v32 = vpop.f32.mrb[20].mxu0 }
 0x1f0   :  { %v3062_v33 = vpack.c.bf16 %v1043_v31, %v1042_v30  ;;  %v887_v34 = vpop.f32.mrb[21].mxu0  ;;  %v3203_v36 = vadd.f32 %v885_v32, %v357_v35 }
 0x1f2   :  { %3063 = vmatpush1.bf16.msra.mxu0 %v3062_v33  ;;  %3181 = vmatpush1.bf16.msra.mxu1 %v3062_v33  ;;  %v1044_v41 = vmax.f32 %v3203_v36, 0.0 }
 0x1f3   :  { %v890_v38 = vpop.f32.mrb[22].mxu0  ;;  %3064 = vmatprep.subr.bf16.mxu0 %v3347_v0  ;;  %3166 = vmatprep.subr.bf16.mxu1 %v3347_v0 }
 0x1f4   :  { %v3204_v39 = vadd.f32 %v890_v38, %v362_v37  ;;  %v892_v40 = vpop.f32.mrb[23].mxu0  ;;  %v417_v38 = vpop.permute.xlu0 %416 }
 0x1f5   :  { %v422_v40 = vpop.permute.xlu1 %421 }
 0x1f6   :  { %v1045_v42 = vmax.f32 %v3204_v39, 0.0 }
 0x1f7   :  { %v895_v43 = vpop.f32.mrb[24].mxu0 }
 0x1f8   :  { %v3065_v44 = vpack.c.bf16 %v1045_v42, %v1044_v41  ;;  %v897_v45 = vpop.f32.mrb[25].mxu0  ;;  %v3205_v47 = vadd.f32 %v895_v43, %v367_v46 }
 0x1fa   :  { %3066 = vmatpush1.bf16.msra.mxu0 %v3065_v44  ;;  %3182 = vmatpush1.bf16.msra.mxu1 %v3065_v44  ;;  %v1046_v52 = vmax.f32 %v3205_v47, 0.0 }
 0x1fb   :  { %v900_v49 = vpop.f32.mrb[26].mxu0  ;;  %3067 = vmatprep.subr.bf16.mxu0 %v3347_v0  ;;  %3167 = vmatprep.subr.bf16.mxu1 %v3347_v0 }
 0x1fc   :  { %v3206_v50 = vadd.f32 %v900_v49, %v372_v48  ;;  %v902_v51 = vpop.f32.mrb[27].mxu0  ;;  %v427_v49 = vpop.permute.xlu0 %426 }
 0x1fd   :  { %v432_v51 = vpop.permute.xlu1 %431 }
 0x1fe   :  { %v1047_v53 = vmax.f32 %v3206_v50, 0.0 }
 0x1ff   :  { %v905_v54 = vpop.f32.mrb[28].mxu0 }
 0x200   :  { %v3068_v55 = vpack.c.bf16 %v1047_v53, %v1046_v52  ;;  %v907_v56 = vpop.f32.mrb[29].mxu0  ;;  %v3207_v58 = vadd.f32 %v905_v54, %v377_v57 }
 0x202   :  { %3069 = vmatpush1.bf16.msra.mxu0 %v3068_v55  ;;  %3183 = vmatpush1.bf16.msra.mxu1 %v3068_v55  ;;  %v1048_v63 = vmax.f32 %v3207_v58, 0.0 }
 0x203   :  { %v910_v60 = vpop.f32.mrb[30].mxu0  ;;  %3070 = vmatprep.subr.bf16.mxu0 %v3347_v0  ;;  %3168 = vmatprep.subr.bf16.mxu1 %v3347_v0 }
 0x204   :  { %v3208_v61 = vadd.f32 %v910_v60, %v382_v59  ;;  %v912_v62 = vpop.f32.mrb[31].mxu0  ;;  %v437_v60 = vpop.permute.xlu0 %436 }
 0x205   :  { %v442_v62 = vpop.permute.xlu1 %441 }
 0x206   :  { %v1049_v1 = vmax.f32 %v3208_v61, 0.0 }
 0x207   :  { %v915_v2 = vpop.f32.mrb[32].mxu0 }
 0x208   :  { %v3071_v3 = vpack.c.bf16 %v1049_v1, %v1048_v63  ;;  %v917_v4 = vpop.f32.mrb[33].mxu0  ;;  %v3209_v6 = vadd.f32 %v915_v2, %v387_v5 }
 0x20a   :  { %3072 = vmatpush1.bf16.msra.mxu0 %v3071_v3  ;;  %3184 = vmatpush1.bf16.msra.mxu1 %v3071_v3  ;;  %v1050_v11 = vmax.f32 %v3209_v6, 0.0 }
 0x20b   :  { %v920_v8 = vpop.f32.mrb[34].mxu0  ;;  %3073 = vmatprep.subr.bf16.mxu0 %v3347_v0  ;;  %3169 = vmatprep.subr.bf16.mxu1 %v3347_v0 }
 0x20c   :  { %v3210_v9 = vadd.f32 %v920_v8, %v392_v7  ;;  %v922_v10 = vpop.f32.mrb[35].mxu0  ;;  %v447_v8 = vpop.permute.xlu0 %446 }
 0x20d   :  { %v452_v10 = vpop.permute.xlu1 %451 }
 0x20e   :  { %v1051_v12 = vmax.f32 %v3210_v9, 0.0 }
 0x20f   :  { %v925_v13 = vpop.f32.mrb[36].mxu0 }
 0x210   :  { %v3074_v14 = vpack.c.bf16 %v1051_v12, %v1050_v11  ;;  %v927_v15 = vpop.f32.mrb[37].mxu0  ;;  %v3211_v17 = vadd.f32 %v925_v13, %v397_v16 }
 0x212   :  { %3075 = vmatpush1.bf16.msra.mxu0 %v3074_v14  ;;  %3185 = vmatpush1.bf16.msra.mxu1 %v3074_v14  ;;  %v1052_v22 = vmax.f32 %v3211_v17, 0.0 }
 0x213   :  { %v930_v19 = vpop.f32.mrb[38].mxu0  ;;  %3076 = vmatprep.subr.bf16.mxu0 %v3347_v0  ;;  %3170 = vmatprep.subr.bf16.mxu1 %v3347_v0 }
 0x214   :  { %v3212_v20 = vadd.f32 %v930_v19, %v402_v18  ;;  %v932_v21 = vpop.f32.mrb[39].mxu0  ;;  %v457_v19 = vpop.permute.xlu0 %456 }
 0x215   :  { %v462_v21 = vpop.permute.xlu1 %461 }
 0x216   :  { %v1053_v23 = vmax.f32 %v3212_v20, 0.0 }
 0x217   :  { %v935_v24 = vpop.f32.mrb[40].mxu0 }
 0x218   :  { %v3077_v25 = vpack.c.bf16 %v1053_v23, %v1052_v22  ;;  %v937_v26 = vpop.f32.mrb[41].mxu0  ;;  %v3213_v28 = vadd.f32 %v935_v24, %v407_v27 }
 0x21a   :  { %3078 = vmatpush1.bf16.msra.mxu0 %v3077_v25  ;;  %3186 = vmatpush1.bf16.msra.mxu1 %v3077_v25  ;;  %v1054_v33 = vmax.f32 %v3213_v28, 0.0 }
 0x21b   :  { %v940_v30 = vpop.f32.mrb[42].mxu0  ;;  %3079 = vmatprep.subr.bf16.mxu0 %v3347_v0  ;;  %3171 = vmatprep.subr.bf16.mxu1 %v3347_v0 }
 0x21c   :  { %v3214_v31 = vadd.f32 %v940_v30, %v412_v29  ;;  %v942_v32 = vpop.f32.mrb[43].mxu0  ;;  %v467_v30 = vpop.permute.xlu0 %466 }
 0x21d   :  { %v1074_v32 = vld [vmem:[#allocation2] sm:$0xff] }
 0x21e   :  { %v1055_v34 = vmax.f32 %v3214_v31, 0.0 }
 0x21f   :  { %v945_v35 = vpop.f32.mrb[44].mxu0 }
 0x220   :  { %v3080_v36 = vpack.c.bf16 %v1055_v34, %v1054_v33  ;;  %v947_v37 = vpop.f32.mrb[45].mxu0  ;;  %v3215_v39 = vadd.f32 %v945_v35, %v417_v38  ;;  %v1080_v33 = vld [vmem:[#allocation2 + $0x30] sm:$0xff]  ;;  %v472_v34 = vpop.permute.xlu1 %471 }
 0x221   :  { %v1084_v37 = vld [vmem:[#allocation2 + $0x50] sm:$0xff] }
 0x222   :  { %3081 = vmatpush1.bf16.msra.mxu0 %v3080_v36  ;;  %3187 = vmatpush1.bf16.msra.mxu1 %v3080_v36  ;;  %v1056_v44 = vmax.f32 %v3215_v39, 0.0  ;;  %v1078_v36 = vld [vmem:[#allocation2 + $0x20] sm:$0xff] }
 0x223   :  { %v950_v41 = vpop.f32.mrb[46].mxu0  ;;  %3082 = vmatprep.subr.bf16.mxu0 %v3347_v0  ;;  %3172 = vmatprep.subr.bf16.mxu1 %v3347_v0 }
 0x224   :  { %v3216_v42 = vadd.f32 %v950_v41, %v422_v40  ;;  %v952_v43 = vpop.f32.mrb[47].mxu0  ;;  %v1077_v41 = vld [vmem:[#allocation2 + $0x18] sm:$0xff] }
 0x226   :  { %v1057_v45 = vmax.f32 %v3216_v42, 0.0  ;;  %v1083_v42 = vld [vmem:[#allocation2 + $0x48] sm:$0xff] }
 0x227   :  { %v955_v46 = vpop.f32.mrb[48].mxu0 }
 0x228   :  { %v3083_v47 = vpack.c.bf16 %v1057_v45, %v1056_v44  ;;  %v957_v48 = vpop.f32.mrb[49].mxu0  ;;  %v3217_v50 = vadd.f32 %v955_v46, %v427_v49  ;;  %v1087_v44 = vld [vmem:[#allocation2 + $0x68] sm:$0xff]  ;;  %v1086_v49 = vld [vmem:[#allocation2 + $0x60] sm:$0xff] }
 0x22a   :  { %3084 = vmatpush1.bf16.msra.mxu0 %v3083_v47  ;;  %3188 = vmatpush1.bf16.msra.mxu1 %v3083_v47  ;;  %v1058_v55 = vmax.f32 %v3217_v50, 0.0  ;;  %v477_v47 = vpop.permute.xlu0 %476  ;;  %v482_v50 = vpop.permute.xlu1 %481 }
 0x22b   :  { %v960_v52 = vpop.f32.mrb[50].mxu0  ;;  %3085 = vmatprep.subr.bf16.mxu0 %v3347_v0  ;;  %3173 = vmatprep.subr.bf16.mxu1 %v3347_v0 }
 0x22c   :  { %v3218_v53 = vadd.f32 %v960_v52, %v432_v51  ;;  %v962_v54 = vpop.f32.mrb[51].mxu0  ;;  %v1090_v52 = vld [vmem:[#allocation2 + $0x80] sm:$0xff] }
 0x22e   :  { %v1059_v56 = vmax.f32 %v3218_v53, 0.0 }
 0x22f   :  { %v965_v57 = vpop.f32.mrb[52].mxu0 }
 0x230   :  { %v3086_v58 = vpack.c.bf16 %v1059_v56, %v1058_v55  ;;  %v967_v59 = vpop.f32.mrb[53].mxu0  ;;  %v3219_v61 = vadd.f32 %v965_v57, %v437_v60  ;;  %v1089_v57 = vld [vmem:[#allocation2 + $0x78] sm:$0xff] }
 0x231   :  { %v1093_v59 = vld [vmem:[#allocation2 + $0x98] sm:$0xff] }
 0x232   :  { %3087 = vmatpush1.bf16.msra.mxu0 %v3086_v58  ;;  %3189 = vmatpush1.bf16.msra.mxu1 %v3086_v58  ;;  %v1060_v3 = vmax.f32 %v3219_v61, 0.0 }
 0x233   :  { %v970_v63 = vpop.f32.mrb[54].mxu0  ;;  %3088 = vmatprep.subr.bf16.mxu0 %v3347_v0  ;;  %3174 = vmatprep.subr.bf16.mxu1 %v3347_v0 }
 0x234   :  { %v3220_v1 = vadd.f32 %v970_v63, %v442_v62  ;;  %v972_v2 = vpop.f32.mrb[55].mxu0  ;;  %v487_v62 = vpop.permute.xlu0 %486 }
 0x235   :  { %v492_v2 = vpop.permute.xlu1 %491 }
 0x236   :  { %v1061_v4 = vmax.f32 %v3220_v1, 0.0  ;;  %v1092_v1 = vld [vmem:[#allocation2 + $0x90] sm:$0xff] }
 0x237   :  { %v975_v5 = vpop.f32.mrb[56].mxu0 }
 0x238   :  { %v3089_v6 = vpack.c.bf16 %v1061_v4, %v1060_v3  ;;  %v977_v7 = vpop.f32.mrb[57].mxu0  ;;  %v3221_v9 = vadd.f32 %v975_v5, %v447_v8  ;;  %v1096_v4 = vld [vmem:[#allocation2 + $0xb0] sm:$0xff] }
 0x23a   :  { %3090 = vmatpush1.bf16.msra.mxu0 %v3089_v6  ;;  %3190 = vmatpush1.bf16.msra.mxu1 %v3089_v6  ;;  %v1062_v14 = vmax.f32 %v3221_v9, 0.0  ;;  %v1095_v9 = vld [vmem:[#allocation2 + $0xa8] sm:$0xff] }
 0x23b   :  { %v980_v11 = vpop.f32.mrb[58].mxu0  ;;  %3091 = vmatprep.subr.bf16.mxu0 %v3347_v0  ;;  %3175 = vmatprep.subr.bf16.mxu1 %v3347_v0 }
 0x23c   :  { %v3222_v12 = vadd.f32 %v980_v11, %v452_v10  ;;  %v982_v13 = vpop.f32.mrb[59].mxu0  ;;  %v1099_v11 = vld [vmem:[#allocation2 + $0xc8] sm:$0xff] }
 0x23e   :  { %v1063_v15 = vmax.f32 %v3222_v12, 0.0 }
 0x23f   :  { %v985_v16 = vpop.f32.mrb[60].mxu0 }
 0x240   :  { %v3092_v17 = vpack.c.bf16 %v1063_v15, %v1062_v14  ;;  %v987_v18 = vpop.f32.mrb[61].mxu0  ;;  %v3223_v20 = vadd.f32 %v985_v16, %v457_v19  ;;  %v497_v14 = vpop.permute.xlu0 %496  ;;  %v1098_v16 = vld [vmem:[#allocation2 + $0xc0] sm:$0xff] }
 0x241   :  { %v1102_v19 = vld [vmem:[#allocation2 + $0xe0] sm:$0xff] }
 0x242   :  { %3093 = vmatpush1.bf16.msra.mxu0 %v3092_v17  ;;  %3191 = vmatpush1.bf16.msra.mxu1 %v3092_v17  ;;  %v1064_v25 = vmax.f32 %v3223_v20, 0.0  ;;  %v502_v17 = vpop.permute.xlu1 %501 }
 0x243   :  { %v990_v22 = vpop.f32.mrb[62].mxu0  ;;  %3094 = vmatprep.subr.bf16.mxu0 %v3347_v0  ;;  %3176 = vmatprep.subr.bf16.mxu1 %v3347_v0 }
 0x244   :  { %v3224_v23 = vadd.f32 %v990_v22, %v462_v21  ;;  %v992_v24 = vpop.f32.mrb[63].mxu0 }
 0x245   :  { %v1101_v24 = vld [vmem:[#allocation2 + $0xd8] sm:$0xff] }
 0x246   :  { %v1065_v26 = vmax.f32 %v3224_v23, 0.0 }
 0x247   :  { %v995_v27 = vpop.f32.mrb[64].mxu0 }
 0x248   :  { %v3095_v28 = vpack.c.bf16 %v1065_v26, %v1064_v25  ;;  %v997_v29 = vpop.f32.mrb[65].mxu0  ;;  %v3225_v31 = vadd.f32 %v995_v27, %v467_v30  ;;  %v1105_v25 = vld [vmem:[#allocation2 + $0xf8] sm:$0xff]  ;;  %v1104_v27 = vld [vmem:[#allocation2 + $0xf0] sm:$0xff]  ;;  %v1111_v30 = vld [vmem:[#allocation2 + $0x128] sm:$0xff] }
 0x249   :  { %v1107_v29 = vld [vmem:[#allocation2 + $0x108] sm:$0xff] }
 0x24a   :  { %3096 = vmatpush1.bf16.msra.mxu0 %v3095_v28  ;;  %3192 = vmatpush1.bf16.msra.mxu1 %v3095_v28  ;;  %v1066_v0 = vmax.f32 %v3225_v31, 0.0  ;;  %v1108_v28 = vld [vmem:[#allocation2 + $0x110] sm:$0xff]  ;;  %v1110_v31 = vld [vmem:[#allocation2 + $0x120] sm:$0xff] }
 0x24b   :  { %v1000_v35 = vpop.f32.mrb[66].mxu0 }
 0x24c   :  { %v3226_v38 = vadd.f32 %v1000_v35, %v472_v34  ;;  %v1002_v39 = vpop.f32.mrb[67].mxu0  ;;  %v1117_v34 = vld [vmem:[#allocation2 + $0x158] sm:$0xff]  ;;  %v1116_v35 = vld [vmem:[#allocation2 + $0x150] sm:$0xff] }
 0x24d   :  { %1620 = vmatmul.mubr.f32.vlgmr.msra.gmra.mrb[80].mxu0 %v1074_v32  ;;  %1630 = vmatmul.mubr.f32.vlgmr.msra.gmra.mrb[0].mxu1 %v1080_v33  ;;  %v1114_v32 = vld [vmem:[#allocation2 + $0x140] sm:$0xff]  ;;  %v1113_v33 = vld [vmem:[#allocation2 + $0x138] sm:$0xff] }
 0x24e   :  { %v1067_v40 = vmax.f32 %v3226_v38, 0.0  ;;  %1624 = vmatprep.mubr.f32.mxu0 %v1078_v36  ;;  %1634 = vmatprep.mubr.f32.mxu1 %v1084_v37  ;;  %v1120_v36 = vld [vmem:[#allocation2 + $0x170] sm:$0xff]  ;;  %v1119_v37 = vld [vmem:[#allocation2 + $0x168] sm:$0xff]  ;;  %v1122_v39 = vld [vmem:[#allocation2 + $0x180] sm:$0xff] }
 0x24f   :  { %v1005_v43 = vpop.f32.mrb[68].mxu0  ;;  %v1123_v38 = vld [vmem:[#allocation2 + $0x188] sm:$0xff] }
 0x250   :  { %v3097_v45 = vpack.c.bf16 %v1067_v40, %v1066_v0  ;;  %v1007_v46 = vpop.f32.mrb[69].mxu0  ;;  %v3227_v48 = vadd.f32 %v1005_v43, %v477_v47  ;;  %v1126_v0 = vld [vmem:[#allocation2 + $0x1a0] sm:$0xff]  ;;  %v1125_v40 = vld [vmem:[#allocation2 + $0x198] sm:$0xff]  ;;  %v1132_v43 = vld [vmem:[#allocation2 + $0x1d0] sm:$0xff] }
 0x251   :  { %1625 = vmatmul.mubr.f32.gmra.mrb[82].mxu0 %v1077_v41  ;;  %1635 = vmatmul.mubr.f32.gmra.mrb[2].mxu1 %v1083_v42  ;;  %v1129_v41 = vld [vmem:[#allocation2 + $0x1b8] sm:$0xff]  ;;  %v1128_v42 = vld [vmem:[#allocation2 + $0x1b0] sm:$0xff]  ;;  %v1134_v46 = vld [vmem:[#allocation2 + $0x1e0] sm:$0xff] }
 0x252   :  { %3098 = vmatprep.subr.bf16.mxu1 %v3097_v45  ;;  %1639 = vmatprep.mubr.f32.mxu1 %v1087_v44  ;;  %v1068_v55 = vmax.f32 %v3227_v48, 0.0  ;;  %v1131_v44 = vld [vmem:[#allocation2 + $0x1c8] sm:$0xff]  ;;  %v1138_v47 = vld [vmem:[#allocation2 + $0x200] sm:$0xff]  ;;  %v1137_v48 = vld [vmem:[#allocation2 + $0x1f8] sm:$0xff] }
 0x253   :  { %v1010_v51 = vpop.f32.mrb[70].mxu0  ;;  %3100 = vmatpush3.bf16.msra.mxu1 %v3097_v45  ;;  %v1135_v45 = vld [vmem:[#allocation2 + $0x1e8] sm:$0xff] }
 0x254   :  { %v3228_v53 = vadd.f32 %v1010_v51, %v482_v50  ;;  %v1012_v54 = vpop.f32.mrb[71].mxu0  ;;  %v1140_v50 = vld [vmem:[#allocation2 + $0x210] sm:$0xff] }
 0x255   :  { %1640 = vmatmul.mubr.f32.gmra.mrb[4].mxu1 %v1086_v49  ;;  %v1141_v49 = vld [vmem:[#allocation2 + $0x218] sm:$0xff]  ;;  %v1144_v51 = vld [vmem:[#allocation2 + $0x230] sm:$0xff]  ;;  %v1146_v54 = vld [vmem:[#allocation2 + $0x240] sm:$0xff] }
 0x256   :  { %v1069_v56 = vmax.f32 %v3228_v53, 0.0  ;;  %1644 = vmatprep.mubr.f32.mxu1 %v1090_v52  ;;  %v1143_v52 = vld [vmem:[#allocation2 + $0x228] sm:$0xff] }
 0x257   :  { %v1015_v58 = vpop.f32.mrb[72].mxu0  ;;  %v1147_v53 = vld [vmem:[#allocation2 + $0x248] sm:$0xff] }
 0x258   :  { %v3101_v60 = vpack.c.bf16 %v1069_v56, %v1068_v55  ;;  %v1017_v61 = vpop.f32.mrb[73].mxu0  ;;  %v3229_v63 = vadd.f32 %v1015_v58, %v487_v62  ;;  %v1150_v55 = vld [vmem:[#allocation2 + $0x260] sm:$0xff]  ;;  %v1149_v56 = vld [vmem:[#allocation2 + $0x258] sm:$0xff]  ;;  %v1152_v58 = vld [vmem:[#allocation2 + $0x270] sm:$0xff] }
 0x259   :  { %1645 = vmatmul.mubr.f32.gmra.mrb[6].mxu1 %v1089_v57  ;;  %v1153_v57 = vld [vmem:[#allocation2 + $0x278] sm:$0xff]  ;;  %v1159_v61 = vld [vmem:[#allocation2 + $0x2a8] sm:$0xff]  ;;  %v1158_v62 = vld [vmem:[#allocation2 + $0x2a0] sm:$0xff] }
 0x25a   :  { %3102 = vmatprep.subr.bf16.mxu1 %v3101_v60  ;;  %1649 = vmatprep.mubr.f32.mxu1 %v1093_v59  ;;  %v1070_v7 = vmax.f32 %v3229_v63, 0.0  ;;  %v1156_v59 = vld [vmem:[#allocation2 + $0x290] sm:$0xff]  ;;  %v1162_v63 = vld [vmem:[#allocation2 + $0x2c0] sm:$0xff] }
 0x25b   :  { %v1020_v3 = vpop.f32.mrb[74].mxu0  ;;  %3104 = vmatpush3.bf16.msra.mxu1 %v3101_v60  ;;  %v1155_v60 = vld [vmem:[#allocation2 + $0x288] sm:$0xff] }
 0x25c   :  { %v3230_v5 = vadd.f32 %v1020_v3, %v492_v2  ;;  %v1022_v6 = vpop.f32.mrb[75].mxu0  ;;  %v1165_v2 = vld [vmem:[#allocation2 + $0x2d8] sm:$0xff]  ;;  %v1164_v3 = vld [vmem:[#allocation2 + $0x2d0] sm:$0xff] }
 0x25d   :  { %1650 = vmatmul.mubr.f32.gmra.mrb[8].mxu1 %v1092_v1  ;;  %v1161_v1 = vld [vmem:[#allocation2 + $0x2b8] sm:$0xff]  ;;  %v1171_v6 = vld [vmem:[#allocation2 + $0x308] sm:$0xff] }
 0x25e   :  { %v1071_v8 = vmax.f32 %v3230_v5, 0.0  ;;  %1654 = vmatprep.mubr.f32.mxu1 %v1096_v4  ;;  %v1168_v4 = vld [vmem:[#allocation2 + $0x2f0] sm:$0xff]  ;;  %v1167_v5 = vld [vmem:[#allocation2 + $0x2e8] sm:$0xff] }
 0x25f   :  { %v1025_v10 = vpop.f32.mrb[76].mxu0 }
 0x260   :  { %v3105_v12 = vpack.c.bf16 %v1071_v8, %v1070_v7  ;;  %v1027_v13 = vpop.f32.mrb[77].mxu0  ;;  %v3231_v15 = vadd.f32 %v1025_v10, %v497_v14  ;;  %v1170_v7 = vld [vmem:[#allocation2 + $0x300] sm:$0xff]  ;;  %v1177_v10 = vld [vmem:[#allocation2 + $0x338] sm:$0xff]  ;;  %v1183_v14 = vld [vmem:[#allocation2 + $0x368] sm:$0xff] }
 0x261   :  { %1655 = vmatmul.mubr.f32.gmra.mrb[10].mxu1 %v1095_v9  ;;  %v1174_v8 = vld [vmem:[#allocation2 + $0x320] sm:$0xff]  ;;  %v1173_v9 = vld [vmem:[#allocation2 + $0x318] sm:$0xff]  ;;  %v1179_v13 = vld [vmem:[#allocation2 + $0x348] sm:$0xff] }
 0x262   :  { %3106 = vmatprep.subr.bf16.mxu1 %v3105_v12  ;;  %1659 = vmatprep.mubr.f32.mxu1 %v1099_v11  ;;  %v1072_v22 = vmax.f32 %v3231_v15, 0.0  ;;  %v1176_v11 = vld [vmem:[#allocation2 + $0x330] sm:$0xff]  ;;  %v1182_v15 = vld [vmem:[#allocation2 + $0x360] sm:$0xff] }
 0x263   :  { %v1030_v18 = vpop.f32.mrb[78].mxu0  ;;  %3108 = vmatpush3.bf16.msra.mxu1 %v3105_v12  ;;  %v1180_v12 = vld [vmem:[#allocation2 + $0x350] sm:$0xff] }
 0x264   :  { %v3232_v20 = vadd.f32 %v1030_v18, %v502_v17  ;;  %v1032_v21 = vpop.f32.mrb[79].mxu0  ;;  %v1185_v17 = vld [vmem:[#allocation2 + $0x378] sm:$0xff] }
 0x265   :  { %1660 = vmatmul.mubr.f32.gmra.mrb[12].mxu1 %v1098_v16  ;;  %v1186_v16 = vld [vmem:[#allocation2 + $0x380] sm:$0xff]  ;;  %v1189_v18 = vld [vmem:[#allocation2 + $0x398] sm:$0xff]  ;;  %v1191_v21 = vld [vmem:[#allocation2 + $0x3a8] sm:$0xff] }
 0x266   :  { %v1073_v23 = vmax.f32 %v3232_v20, 0.0  ;;  %1664 = vmatprep.mubr.f32.mxu1 %v1102_v19  ;;  %v1188_v19 = vld [vmem:[#allocation2 + $0x390] sm:$0xff] }
 0x267   :  { %v1192_v20 = vld [vmem:[#allocation2 + $0x3b0] sm:$0xff] }
 0x268   :  { %v3109_v26 = vpack.c.bf16 %v1073_v23, %v1072_v22  ;;  %v1076_v22 = vld [vmem:[#allocation2 + $0x10] sm:$0xff]  ;;  %v1079_v23 = vld [vmem:[#allocation2 + $0x28] sm:$0xff] }
 0x269   :  { %1665 = vmatmul.mubr.f32.gmra.mrb[14].mxu1 %v1101_v24  ;;  %v1082_v24 = vld [vmem:[#allocation2 + $0x40] sm:$0xff] }
 0x26a   :  { %3110 = vmatprep.subr.bf16.mxu1 %v3109_v26  ;;  %1669 = vmatprep.mubr.f32.mxu1 %v1105_v25  ;;  %v1085_v25 = vld [vmem:[#allocation2 + $0x58] sm:$0xff] }
 0x26b   :  { %3112 = vmatpush3.bf16.msra.mxu1 %v3109_v26  ;;  %v1088_v26 = vld [vmem:[#allocation2 + $0x70] sm:$0xff] }
 0x26d   :  { %1670 = vmatmul.mubr.f32.gmra.mrb[16].mxu1 %v1104_v27  ;;  %v1091_v27 = vld [vmem:[#allocation2 + $0x88] sm:$0xff] }
 0x26e   :  { %1674 = vmatprep.mubr.f32.mxu1 %v1108_v28  ;;  %v1094_v28 = vld [vmem:[#allocation2 + $0xa0] sm:$0xff] }
 0x271   :  { %1675 = vmatmul.mubr.f32.gmra.mrb[18].mxu1 %v1107_v29  ;;  %v1097_v29 = vld [vmem:[#allocation2 + $0xb8] sm:$0xff] }
 0x272   :  { %1679 = vmatprep.mubr.f32.mxu1 %v1111_v30  ;;  %v1100_v30 = vld [vmem:[#allocation2 + $0xd0] sm:$0xff] }
 0x275   :  { %1680 = vmatmul.mubr.f32.gmra.mrb[20].mxu1 %v1110_v31  ;;  %v1103_v31 = vld [vmem:[#allocation2 + $0xe8] sm:$0xff] }
 0x276   :  { %1684 = vmatprep.mubr.f32.mxu1 %v1114_v32  ;;  %v1106_v32 = vld [vmem:[#allocation2 + $0x100] sm:$0xff] }
 0x279   :  { %1685 = vmatmul.mubr.f32.gmra.mrb[22].mxu1 %v1113_v33  ;;  %v1109_v33 = vld [vmem:[#allocation2 + $0x118] sm:$0xff] }
 0x27a   :  { %1689 = vmatprep.mubr.f32.mxu1 %v1117_v34  ;;  %v1112_v34 = vld [vmem:[#allocation2 + $0x130] sm:$0xff] }
 0x27d   :  { %1690 = vmatmul.mubr.f32.gmra.mrb[24].mxu1 %v1116_v35  ;;  %v1115_v35 = vld [vmem:[#allocation2 + $0x148] sm:$0xff] }
 0x27e   :  { %1694 = vmatprep.mubr.f32.mxu1 %v1120_v36  ;;  %v1118_v36 = vld [vmem:[#allocation2 + $0x160] sm:$0xff] }
 0x281   :  { %1695 = vmatmul.mubr.f32.gmra.mrb[26].mxu1 %v1119_v37  ;;  %v1121_v37 = vld [vmem:[#allocation2 + $0x178] sm:$0xff] }
 0x282   :  { %1699 = vmatprep.mubr.f32.mxu1 %v1123_v38  ;;  %v1124_v38 = vld [vmem:[#allocation2 + $0x190] sm:$0xff] }
 0x285   :  { %1700 = vmatmul.mubr.f32.gmra.mrb[28].mxu1 %v1122_v39  ;;  %v1127_v39 = vld [vmem:[#allocation2 + $0x1a8] sm:$0xff] }
 0x286   :  { %1704 = vmatprep.mubr.f32.mxu1 %v1126_v0  ;;  %v1130_v0 = vld [vmem:[#allocation2 + $0x1c0] sm:$0xff] }
 0x289   :  { %1705 = vmatmul.mubr.f32.gmra.mrb[30].mxu1 %v1125_v40  ;;  %v1133_v40 = vld [vmem:[#allocation2 + $0x1d8] sm:$0xff] }
 0x28a   :  { %1709 = vmatprep.mubr.f32.mxu1 %v1129_v41  ;;  %v1136_v41 = vld [vmem:[#allocation2 + $0x1f0] sm:$0xff] }
 0x28d   :  { %1710 = vmatmul.mubr.f32.gmra.mrb[32].mxu1 %v1128_v42  ;;  %v1139_v42 = vld [vmem:[#allocation2 + $0x208] sm:$0xff] }
 0x28e   :  { %1714 = vmatprep.mubr.f32.mxu1 %v1132_v43  ;;  %v1142_v43 = vld [vmem:[#allocation2 + $0x220] sm:$0xff] }
 0x291   :  { %1715 = vmatmul.mubr.f32.gmra.mrb[34].mxu1 %v1131_v44  ;;  %v1145_v44 = vld [vmem:[#allocation2 + $0x238] sm:$0xff] }
 0x292   :  { %1719 = vmatprep.mubr.f32.mxu1 %v1135_v45  ;;  %v1148_v45 = vld [vmem:[#allocation2 + $0x250] sm:$0xff] }
 0x295   :  { %1720 = vmatmul.mubr.f32.gmra.mrb[36].mxu1 %v1134_v46  ;;  %v1151_v46 = vld [vmem:[#allocation2 + $0x268] sm:$0xff] }
 0x296   :  { %1724 = vmatprep.mubr.f32.mxu1 %v1138_v47  ;;  %v1154_v47 = vld [vmem:[#allocation2 + $0x280] sm:$0xff] }
 0x299   :  { %1725 = vmatmul.mubr.f32.gmra.mrb[38].mxu1 %v1137_v48  ;;  %v1157_v48 = vld [vmem:[#allocation2 + $0x298] sm:$0xff] }
 0x29a   :  { %1729 = vmatprep.mubr.f32.mxu1 %v1141_v49  ;;  %v1160_v49 = vld [vmem:[#allocation2 + $0x2b0] sm:$0xff] }
 0x29d   :  { %1730 = vmatmul.mubr.f32.gmra.mrb[40].mxu1 %v1140_v50  ;;  %v1163_v50 = vld [vmem:[#allocation2 + $0x2c8] sm:$0xff] }
 0x29e   :  { %1734 = vmatprep.mubr.f32.mxu1 %v1144_v51  ;;  %v1166_v51 = vld [vmem:[#allocation2 + $0x2e0] sm:$0xff] }
 0x2a1   :  { %1735 = vmatmul.mubr.f32.gmra.mrb[42].mxu1 %v1143_v52  ;;  %v1169_v52 = vld [vmem:[#allocation2 + $0x2f8] sm:$0xff] }
 0x2a2   :  { %1739 = vmatprep.mubr.f32.mxu1 %v1147_v53  ;;  %v1172_v53 = vld [vmem:[#allocation2 + $0x310] sm:$0xff] }
 0x2a5   :  { %1740 = vmatmul.mubr.f32.gmra.mrb[44].mxu1 %v1146_v54 }
 0x2a6   :  { %1744 = vmatprep.mubr.f32.mxu1 %v1150_v55 }
 0x2a9   :  { %1745 = vmatmul.mubr.f32.gmra.mrb[46].mxu1 %v1149_v56 }
 0x2aa   :  { %1749 = vmatprep.mubr.f32.mxu1 %v1153_v57 }
 0x2ad   :  { %1750 = vmatmul.mubr.f32.gmra.mrb[48].mxu1 %v1152_v58  ;;  %v1175_v58 = vld [vmem:[#allocation2 + $0x328] sm:$0xff] }
 0x2ae   :  { %1754 = vmatprep.mubr.f32.mxu1 %v1156_v59  ;;  %v1178_v59 = vld [vmem:[#allocation2 + $0x340] sm:$0xff] }
 0x2b1   :  { %1755 = vmatmul.mubr.f32.gmra.mrb[50].mxu1 %v1155_v60 }
 0x2b2   :  { %1759 = vmatprep.mubr.f32.mxu1 %v1159_v61 }
 0x2b5   :  { %1760 = vmatmul.mubr.f32.gmra.mrb[52].mxu1 %v1158_v62 }
 0x2b6   :  { %1764 = vmatprep.mubr.f32.mxu1 %v1162_v63 }
 0x2b9   :  { %1765 = vmatmul.mubr.f32.gmra.mrb[54].mxu1 %v1161_v1  ;;  %v1181_v1 = vld [vmem:[#allocation2 + $0x358] sm:$0xff] }
 0x2ba   :  { %1769 = vmatprep.mubr.f32.mxu1 %v1165_v2  ;;  %v1184_v2 = vld [vmem:[#allocation2 + $0x370] sm:$0xff] }
 0x2bd   :  { %1770 = vmatmul.mubr.f32.gmra.mrb[56].mxu1 %v1164_v3 }
 0x2be   :  { %1774 = vmatprep.mubr.f32.mxu1 %v1168_v4 }
 0x2c1   :  { %1775 = vmatmul.mubr.f32.gmra.mrb[58].mxu1 %v1167_v5  ;;  %v1187_v5 = vld [vmem:[#allocation2 + $0x388] sm:$0xff] }
 0x2c2   :  { %1779 = vmatprep.mubr.f32.mxu1 %v1171_v6  ;;  %v1190_v6 = vld [vmem:[#allocation2 + $0x3a0] sm:$0xff] }
 0x2c5   :  { %1780 = vmatmul.mubr.f32.gmra.mrb[60].mxu1 %v1170_v7 }
 0x2c6   :  { %1784 = vmatprep.mubr.f32.mxu1 %v1174_v8 }
 0x2c9   :  { %1785 = vmatmul.mubr.f32.gmra.mrb[62].mxu1 %v1173_v9  ;;  %v1193_v9 = vld [vmem:[#allocation2 + $0x3b8] sm:$0xff] }
 0x2ca   :  { %1789 = vmatprep.mubr.f32.mxu1 %v1177_v10 }
 0x2cd   :  { %1790 = vmatmul.mubr.f32.gmra.mrb[64].mxu1 %v1176_v11 }
 0x2ce   :  { %1794 = vmatprep.mubr.f32.mxu1 %v1180_v12 }
 0x2d1   :  { %1795 = vmatmul.mubr.f32.gmra.mrb[66].mxu1 %v1179_v13 }
 0x2d2   :  { %1799 = vmatprep.mubr.f32.mxu1 %v1183_v14 }
 0x2d5   :  { %1800 = vmatmul.mubr.f32.gmra.mrb[68].mxu1 %v1182_v15 }
 0x2d6   :  { %1804 = vmatprep.mubr.f32.mxu1 %v1186_v16 }
 0x2d9   :  { %1805 = vmatmul.mubr.f32.gmra.mrb[70].mxu1 %v1185_v17 }
 0x2da   :  { %1809 = vmatprep.mubr.f32.mxu1 %v1189_v18 }
 0x2dd   :  { %1810 = vmatmul.mubr.f32.gmra.mrb[72].mxu1 %v1188_v19 }
 0x2de   :  { %1814 = vmatprep.mubr.f32.mxu1 %v1192_v20 }
 0x2e1   :  { %1815 = vmatmul.mubr.f32.gmra.mrb[74].mxu1 %v1191_v21 }
 0x2e2   :  { %2853 = vmatprep.mubr.msk.f32.mxu1 %vm1434_vm0, %v1076_v22 }
 0x2e5   :  { %2854 = vmatmul.mubr.msk.f32.vlgmr.msra.gmra.mrb[76].mxu1 %vm1434_vm0, %v1079_v23 }
 0x2e6   :  { %2856 = vmatprep.mubr.msk.f32.mxu1 %vm1434_vm0, %v1082_v24 }
 0x2e9   :  { %2857 = vmatmul.mubr.msk.f32.gmra.mrb[78].mxu1 %vm1434_vm0, %v1085_v25 }
 0x2ea   :  { %2859 = vmatprep.mubr.msk.f32.mxu1 %vm1434_vm0, %v1088_v26 }
 0x2ed   :  { %2860 = vmatmul.mubr.msk.f32.gmra.mrb[80].mxu1 %vm1434_vm0, %v1091_v27 }
 0x2ee   :  { %2862 = vmatprep.mubr.msk.f32.mxu1 %vm1434_vm0, %v1094_v28 }
 0x2f1   :  { %2863 = vmatmul.mubr.msk.f32.gmra.mrb[82].mxu1 %vm1434_vm0, %v1097_v29 }
 0x2f2   :  { %2865 = vmatprep.mubr.msk.f32.mxu1 %vm1434_vm0, %v1100_v30 }
 0x2f5   :  { %2866 = vmatmul.mubr.msk.f32.gmra.mrb[84].mxu1 %vm1434_vm0, %v1103_v31 }
 0x2f6   :  { %2868 = vmatprep.mubr.msk.f32.mxu1 %vm1434_vm0, %v1106_v32 }
 0x2f9   :  { %2869 = vmatmul.mubr.msk.f32.gmra.mrb[86].mxu1 %vm1434_vm0, %v1109_v33 }
 0x2fa   :  { %2871 = vmatprep.mubr.msk.f32.mxu1 %vm1434_vm0, %v1112_v34 }
 0x2fd   :  { %2872 = vmatmul.mubr.msk.f32.gmra.mrb[88].mxu1 %vm1434_vm0, %v1115_v35 }
 0x2fe   :  { %2874 = vmatprep.mubr.msk.f32.mxu1 %vm1434_vm0, %v1118_v36 }
 0x301   :  { %2875 = vmatmul.mubr.msk.f32.gmra.mrb[90].mxu1 %vm1434_vm0, %v1121_v37 }
 0x302   :  { %2877 = vmatprep.mubr.msk.f32.mxu1 %vm1434_vm0, %v1124_v38 }
 0x305   :  { %2878 = vmatmul.mubr.msk.f32.gmra.mrb[92].mxu1 %vm1434_vm0, %v1127_v39 }
 0x306   :  { %2880 = vmatprep.mubr.msk.f32.mxu1 %vm1434_vm0, %v1130_v0 }
 0x309   :  { %2881 = vmatmul.mubr.msk.f32.gmra.mrb[94].mxu1 %vm1434_vm0, %v1133_v40 }
 0x30a   :  { %2883 = vmatprep.mubr.msk.f32.mxu1 %vm1434_vm0, %v1136_v41 }
 0x30d   :  { %2884 = vmatmul.mubr.msk.f32.gmra.mrb[96].mxu1 %vm1434_vm0, %v1139_v42 }
 0x30e   :  { %2886 = vmatprep.mubr.msk.f32.mxu1 %vm1434_vm0, %v1142_v43 }
 0x311   :  { %2887 = vmatmul.mubr.msk.f32.gmra.mrb[98].mxu1 %vm1434_vm0, %v1145_v44 }
 0x312   :  { %2889 = vmatprep.mubr.msk.f32.mxu1 %vm1434_vm0, %v1148_v45  ;;  %v4513_v45 = vpop.permute.xlu1 %1321 }
 0x315   :  { %2890 = vmatmul.mubr.msk.f32.gmra.mrb[100].mxu1 %vm1434_vm0, %v1151_v46 }
 0x316   :  { %2892 = vmatprep.mubr.msk.f32.mxu1 %vm1434_vm0, %v1154_v47  ;;  %v4517_v47 = vpop.permute.xlu0 %1316 }
 0x319   :  { %2893 = vmatmul.mubr.msk.f32.gmra.mrb[102].mxu1 %vm1434_vm0, %v1157_v48 }
 0x31a   :  { %2895 = vmatprep.mubr.msk.f32.mxu1 %vm1434_vm0, %v1160_v49 }
 0x31d   :  { %2896 = vmatmul.mubr.msk.f32.gmra.mrb[104].mxu1 %vm1434_vm0, %v1163_v50 }
 0x31e   :  { %2898 = vmatprep.mubr.msk.f32.mxu1 %vm1434_vm0, %v1166_v51  ;;  %v1242_v51 = vpop.permute.xlu1 %1241 }
 0x320   :  { %v4456_v54 = vpop.f32.mrb[80].mxu0  ;;  %v4458_v55 = vpop.f32.mrb[0].mxu1 }
 0x321   :  { %v1633_v56 = vpop.f32.mrb[1].mxu1  ;;  %2899 = vmatmul.mubr.msk.f32.gmra.mrb[106].mxu1 %vm1434_vm0, %v1169_v52  ;;  %v1623_v57 = vpop.f32.mrb[81].mxu0  ;;  %v2126_v52 = vld [vmem:[%s4913_s5 + $0x8] sm:$0xff] }
 0x322   :  { %2901 = vmatprep.mubr.msk.f32.mxu1 %vm1434_vm0, %v1172_v53  ;;  %v1237_v53 = vpop.permute.xlu0 %1236 }
 0x324   :  { %v4462_v60 = vpop.f32.mrb[82].mxu0  ;;  %v4464_v61 = vpop.f32.mrb[2].mxu1 }
 0x325   :  { %v1638_v62 = vpop.f32.mrb[3].mxu1  ;;  %2902 = vmatmul.mubr.msk.f32.gmra.mrb[108].mxu1 %vm1434_vm0, %v1175_v58  ;;  %v1628_v63 = vpop.f32.mrb[83].mxu0 }
 0x326   :  { %2904 = vmatprep.mubr.msk.f32.mxu1 %vm1434_vm0, %v1178_v59  ;;  %v4526_v58 = vpop.permute.xlu1 %1331  ;;  %v4530_v62 = vpop.permute.xlu0 %1326 }
 0x328   :  { %v4468_v3 = vpop.f32.mrb[4].mxu1 }
 0x329   :  { %v1643_v4 = vpop.f32.mrb[5].mxu1  ;;  %2905 = vmatmul.mubr.msk.f32.gmra.mrb[110].mxu1 %vm1434_vm0, %v1181_v1 }
 0x32a   :  { %2907 = vmatprep.mubr.msk.f32.mxu1 %vm1434_vm0, %v1184_v2  ;;  %v1252_v4 = vpop.permute.xlu1 %1251 }
 0x32c   :  { %v4472_v7 = vpop.f32.mrb[6].mxu1 }
 0x32d   :  { %v1648_v8 = vpop.f32.mrb[7].mxu1  ;;  %2908 = vmatmul.mubr.msk.f32.gmra.mrb[112].mxu1 %vm1434_vm0, %v1187_v5  ;;  %v1247_v5 = vpop.permute.xlu0 %1246 }
 0x32e   :  { %2910 = vmatprep.mubr.msk.f32.mxu1 %vm1434_vm0, %v1190_v6 }
 0x330   :  { %v4476_v10 = vpop.f32.mrb[8].mxu1 }
 0x331   :  { %v1653_v11 = vpop.f32.mrb[9].mxu1  ;;  %2911 = vmatmul.mubr.msk.f32.gmra.mrb[114].mxu1 %vm1434_vm0, %v1193_v9  ;;  %v4536_v9 = vpop.permute.xlu1 %1341 }
 0x332   :  { %2381 = vmatprep.mubr.f32.mxu1 %v2126_v52 }
 0x334   :  { %v4479_v12 = vpop.f32.mrb[10].mxu1 }
 0x335   :  { %v1658_v13 = vpop.f32.mrb[11].mxu1 }
 0x336   :  { %v4540_v13 = vpop.permute.xlu0 %1336 }
 0x338   :  { %v4481_v14 = vpop.f32.mrb[12].mxu1 }
 0x339   :  { %v1663_v15 = vpop.f32.mrb[13].mxu1 }
 0x33c   :  { %v4483_v16 = vpop.f32.mrb[14].mxu1 }
 0x33d   :  { %v1668_v17 = vpop.f32.mrb[15].mxu1 }
 0x340   :  { %v4485_v18 = vpop.f32.mrb[16].mxu1 }
 0x341   :  { %v1673_v19 = vpop.f32.mrb[17].mxu1 }
 0x344   :  { %v4487_v20 = vpop.f32.mrb[18].mxu1 }
 0x345   :  { %v1678_v21 = vpop.f32.mrb[19].mxu1 }
 0x346   :  { %v1262_v21 = vpop.permute.xlu1 %1261 }
 0x348   :  { %v4489_v22 = vpop.f32.mrb[20].mxu1 }
 0x349   :  { %v1683_v23 = vpop.f32.mrb[21].mxu1 }
 0x34a   :  { %v1257_v23 = vpop.permute.xlu0 %1256 }
 0x34c   :  { %v4491_v24 = vpop.f32.mrb[22].mxu1 }
 0x34d   :  { %v1688_v25 = vpop.f32.mrb[23].mxu1 }
 0x350   :  { %v4493_v26 = vpop.f32.mrb[24].mxu1 }
 0x351   :  { %v1693_v27 = vpop.f32.mrb[25].mxu1 }
 0x354   :  { %v4495_v28 = vpop.f32.mrb[26].mxu1 }
 0x355   :  { %v1698_v29 = vpop.f32.mrb[27].mxu1 }
 0x356   :  { %v4546_v29 = vpop.permute.xlu1 %1351 }
 0x358   :  { %v4497_v30 = vpop.f32.mrb[28].mxu1 }
 0x359   :  { %v1703_v31 = vpop.f32.mrb[29].mxu1 }
 0x35c   :  { %v4499_v32 = vpop.f32.mrb[30].mxu1 }
 0x35d   :  { %v1708_v33 = vpop.f32.mrb[31].mxu1 }
 0x35e   :  { %v4550_v33 = vpop.permute.xlu0 %1346 }
 0x360   :  { %v4501_v34 = vpop.f32.mrb[32].mxu1 }
 0x361   :  { %v1713_v35 = vpop.f32.mrb[33].mxu1 }
 0x364   :  { %v4503_v36 = vpop.f32.mrb[34].mxu1 }
 0x365   :  { %v1718_v37 = vpop.f32.mrb[35].mxu1 }
 0x368   :  { %v4505_v38 = vpop.f32.mrb[36].mxu1 }
 0x369   :  { %v1723_v39 = vpop.f32.mrb[37].mxu1 }
 0x36c   :  { %v4507_v0 = vpop.f32.mrb[38].mxu1 }
 0x36d   :  { %v1728_v40 = vpop.f32.mrb[39].mxu1 }
 0x36e   :  { %v1272_v40 = vpop.permute.xlu1 %1271 }
 0x370   :  { %v4509_v41 = vpop.f32.mrb[40].mxu1 }
 0x371   :  { %v1733_v42 = vpop.f32.mrb[41].mxu1 }
 0x372   :  { %v1267_v42 = vpop.permute.xlu0 %1266 }
 0x374   :  { %v4511_v43 = vpop.f32.mrb[42].mxu1 }
 0x375   :  { %v1738_v44 = vpop.f32.mrb[43].mxu1 }
 0x378   :  { %v4515_v46 = vpop.f32.mrb[44].mxu1 }
 0x379   :  { %v1743_v48 = vpop.f32.mrb[45].mxu1 }
 0x37c   :  { %v4519_v49 = vpop.f32.mrb[46].mxu1 }
 0x37d   :  { %v1748_v50 = vpop.f32.mrb[47].mxu1 }
 0x37e   :  { %v4556_v50 = vpop.permute.xlu1 %1361 }
 0x380   :  { %v4524_v56 = vpop.f32.mrb[48].mxu1 }
 0x381   :  { %4916 = vst [vmem:[#allocation5_spill] sm:$0xff] %v4524_v56  ;;  %v1753_v57 = vpop.f32.mrb[49].mxu1 }
 0x382   :  { %v4560_v57 = vpop.permute.xlu0 %1356 }
 0x384   :  { %v4528_v59 = vpop.f32.mrb[50].mxu1 }
 0x385   :  { %v1758_v63 = vpop.f32.mrb[51].mxu1 }
 0x388   :  { %v4532_v1 = vpop.f32.mrb[52].mxu1 }
 0x389   :  { %4917 = vst [vmem:[#allocation6_spill] sm:$0xff] %v4532_v1  ;;  %v1763_v2 = vpop.f32.mrb[53].mxu1  ;;  %v1632_v1 = vadd.f32 %v4458_v55, %v1247_v5 }
 0x38c   :  { %v4534_v6 = vpop.f32.mrb[54].mxu1 }
 0x38d   :  { %4918 = vst [vmem:[#allocation7_spill] sm:$0xff] %v4534_v6  ;;  %v1768_v8 = vpop.f32.mrb[55].mxu1 }
 0x390   :  { %v4538_v11 = vpop.f32.mrb[56].mxu1 }
 0x391   :  { %4919 = vst [vmem:[#allocation8_spill] sm:$0xff] %v4538_v11  ;;  %v1773_v15 = vpop.f32.mrb[57].mxu1 }
 0x392   :  { %v1282_v15 = vpop.permute.xlu1 %1281 }
 0x394   :  { %v4542_v17 = vpop.f32.mrb[58].mxu1 }
 0x395   :  { %4920 = vst [vmem:[#allocation9_spill] sm:$0xff] %v4542_v17  ;;  %v1778_v19 = vpop.f32.mrb[59].mxu1 }
 0x396   :  { %v1277_v19 = vpop.permute.xlu0 %1276 }
 0x398   :  { %v4544_v25 = vpop.f32.mrb[60].mxu1 }
 0x399   :  { %4921 = vst [vmem:[#allocation10_spill] sm:$0xff] %v4544_v25  ;;  %v1783_v27 = vpop.f32.mrb[61].mxu1  ;;  %v1622_v25 = vadd.f32 %v4456_v54, %v1237_v53  ;;  %v1647_v54 = vadd.f32 %v4472_v7, %v1262_v21 }
 0x39c   :  { %v4548_v31 = vpop.f32.mrb[62].mxu1 }
 0x39d   :  { %4922 = vst [vmem:[#allocation11_spill] sm:$0xff] %v4548_v31  ;;  %v1788_v35 = vpop.f32.mrb[63].mxu1 }
 0x3a0   :  { %v4552_v37 = vpop.f32.mrb[64].mxu1 }
 0x3a1   :  { %4923 = vst [vmem:[#allocation12_spill] sm:$0xff] %v4552_v37  ;;  %v1793_v39 = vpop.f32.mrb[65].mxu1 }
 0x3a2   :  { %v4566_v39 = vpop.permute.xlu1 %1371 }
 0x3a4   :  { %v4554_v44 = vpop.f32.mrb[66].mxu1 }
 0x3a5   :  { %4924 = vst [vmem:[#allocation13_spill] sm:$0xff] %v4554_v44  ;;  %v1798_v48 = vpop.f32.mrb[67].mxu1 }
 0x3a6   :  { %v4570_v48 = vpop.permute.xlu0 %1366 }
 0x3a7   :  { %4929 = vst [vmem:[#allocation18_spill] sm:$0xff] %v4570_v48 }
 0x3a8   :  { %v4558_v52 = vpop.f32.mrb[68].mxu1 }
 0x3a9   :  { %4925 = vst [vmem:[#allocation14_spill] sm:$0xff] %v4558_v52  ;;  %v1803_v63 = vpop.f32.mrb[69].mxu1  ;;  %v1627_v52 = vadd.f32 %v4462_v60, %v1242_v51 }
 0x3aa   :  { %v1287_v17 = vpop.permute.xlu0 %1286 }
 0x3ac   :  { %v4562_v2 = vpop.f32.mrb[70].mxu1 }
 0x3ad   :  { %4926 = vst [vmem:[#allocation15_spill] sm:$0xff] %v4562_v2  ;;  %v1808_v8 = vpop.f32.mrb[71].mxu1 }
 0x3ae   :  { %v1292_v8 = vpop.permute.xlu1 %1291 }
 0x3b0   :  { %v4564_v27 = vpop.f32.mrb[72].mxu1 }
 0x3b1   :  { %4927 = vst [vmem:[#allocation16_spill] sm:$0xff] %v4564_v27  ;;  %v1813_v35 = vpop.f32.mrb[73].mxu1  ;;  %v1637_v27 = vadd.f32 %v4464_v61, %v1252_v4  ;;  %v4582_v61 = vpop.permute.xlu0 %1376 }
 0x3b2   :  { %v4579_v53 = vpop.permute.xlu1 %1381 }
 0x3b4   :  { %v4568_v37 = vpop.f32.mrb[74].mxu1 }
 0x3b5   :  { %4928 = vst [vmem:[#allocation17_spill] sm:$0xff] %v4568_v37  ;;  %v1818_v44 = vpop.f32.mrb[75].mxu1 }
 0x3b8   :  { %v2855_v63 = vpop.f32.mrb[76].mxu1 }
 0x3b9   :  { %v1892_v31 = vadd.f32 %v2855_v63, %v1627_v52  ;;  %v1886_v2 = vpop.f32.mrb[77].mxu1  ;;  %v1667_v63 = vadd.f32 %v4483_v16, %v1282_v15 }
 0x3ba   :  { %v1887_v11 = vadd.f32 %v1886_v2, %v1622_v25  ;;  %v1642_v25 = vadd.f32 %v4468_v3, %v1257_v23 }
 0x3bb   :  { %v2086_v35 = vmax.f32 %v1892_v31, 0.0 }
 0x3bc   :  { %v2085_v6 = vmax.f32 %v1887_v11, 0.0  ;;  %v2858_v37 = vpop.f32.mrb[78].mxu1 }
 0x3bd   :  { %v1902_v56 = vadd.f32 %v2858_v37, %v1637_v27  ;;  %v1896_v48 = vpop.f32.mrb[79].mxu1  ;;  %v1302_v27 = vpop.permute.xlu1 %1301 }
 0x3be   :  { %v4576_v44 = vpack.c.bf16 %v2086_v35, %v2085_v6  ;;  %v1897_v60 = vadd.f32 %v1896_v48, %v1632_v1  ;;  %v1657_v6 = vadd.f32 %v4479_v12, %v1272_v40  ;;  %v1652_v1 = vadd.f32 %v4476_v10, %v1267_v42  ;;  %v1297_v48 = vpop.permute.xlu0 %1296 }
 0x3bf   :  { %v2088_v51 = vmax.f32 %v1902_v56, 0.0  ;;  %v1677_v42 = vadd.f32 %v4487_v20, %v1292_v8 }
 0x3c0   :  { %v2087_v52 = vmax.f32 %v1897_v60, 0.0  ;;  %v2861_v2 = vpop.f32.mrb[80].mxu1  ;;  %v1662_v60 = vadd.f32 %v4481_v14, %v1277_v19 }
 0x3c1   :  { %v1912_v4 = vadd.f32 %v2861_v2, %v1647_v54  ;;  %v1906_v55 = vpop.f32.mrb[81].mxu1  ;;  %v4595_v2 = vpop.permute.xlu1 %1391 }
 0x3c2   :  { %v4584_v5 = vpack.c.bf16 %v2088_v51, %v2087_v52  ;;  %v1907_v11 = vadd.f32 %v1906_v55, %v1642_v25  ;;  %v4598_v16 = vpop.permute.xlu0 %1386 }
 0x3c3   :  { %v2090_v31 = vmax.f32 %v1912_v4, 0.0  ;;  %v1672_v4 = vadd.f32 %v4485_v18, %v1287_v17 }
 0x3c4   :  { %v2089_v7 = vmax.f32 %v1907_v11, 0.0  ;;  %v2864_v56 = vpop.f32.mrb[82].mxu1 }
 0x3c5   :  { %v1922_v21 = vadd.f32 %v2864_v56, %v1657_v6  ;;  %v1916_v37 = vpop.f32.mrb[83].mxu1 }
 0x3c6   :  { %v4588_v3 = vpack.c.bf16 %v2090_v31, %v2089_v7  ;;  %v1917_v23 = vadd.f32 %v1916_v37, %v1652_v1  ;;  %v1687_v31 = vadd.f32 %v4491_v24, %v1302_v27  ;;  %v1682_v7 = vadd.f32 %v4489_v22, %v1297_v48  ;;  %v1312_v37 = vpop.permute.xlu1 %1311 }
 0x3c7   :  { %v2092_v35 = vmax.f32 %v1922_v21, 0.0  ;;  %v1707_v48 = vadd.f32 %v4499_v32, %v4513_v45 }
 0x3c8   :  { %v2091_v54 = vmax.f32 %v1917_v23, 0.0  ;;  %v2867_v51 = vpop.f32.mrb[84].mxu1  ;;  %v1307_v23 = vpop.permute.xlu0 %1306 }
 0x3c9   :  { %v1932_v12 = vadd.f32 %v2867_v51, %v1667_v63  ;;  %v1926_v40 = vpop.f32.mrb[85].mxu1  ;;  %v1697_v63 = vadd.f32 %v4495_v28, %v1312_v37 }
 0x3ca   :  { %v4592_v25 = vpack.c.bf16 %v2092_v35, %v2091_v54  ;;  %v1927_v10 = vadd.f32 %v1926_v40, %v1662_v60  ;;  %v1692_v60 = vadd.f32 %v4493_v26, %v1307_v23 }
 0x3cb   :  { %v2094_v52 = vmax.f32 %v1932_v12, 0.0 }
 0x3cc   :  { %v2093_v55 = vmax.f32 %v1927_v10, 0.0  ;;  %v2870_v11 = vpop.f32.mrb[86].mxu1  ;;  %v1702_v10 = vadd.f32 %v4497_v30, %v4517_v47  ;;  %v1727_v47 = vadd.f32 %v4507_v0, %v4536_v9  ;;  %v1732_v0 = vadd.f32 %v4509_v41, %v4550_v33 }
 0x3cd   :  { %v1942_v15 = vadd.f32 %v2870_v11, %v1677_v42  ;;  %v1936_v14 = vpop.f32.mrb[87].mxu1  ;;  %v1717_v11 = vadd.f32 %v4503_v36, %v4526_v58 }
 0x3ce   :  { %v4600_v19 = vpack.c.bf16 %v2094_v52, %v2093_v55  ;;  %v1937_v6 = vadd.f32 %v1936_v14, %v1672_v4  ;;  %v1712_v14 = vadd.f32 %v4501_v34, %v4530_v62 }
 0x3cf   :  { %v2096_v1 = vmax.f32 %v1942_v15, 0.0 }
 0x3d0   :  { %v2095_v20 = vmax.f32 %v1937_v6, 0.0  ;;  %v2873_v8 = vpop.f32.mrb[88].mxu1 }
 0x3d1   :  { %v1952_v56 = vadd.f32 %v2873_v8, %v1687_v31  ;;  %v1946_v21 = vpop.f32.mrb[89].mxu1 }
 0x3d2   :  { %v4604_v18 = vpack.c.bf16 %v2096_v1, %v2095_v20  ;;  %v1947_v17 = vadd.f32 %v1946_v21, %v1682_v7  ;;  %v1722_v20 = vadd.f32 %v4505_v38, %v4540_v13  ;;  %v1737_v21 = vadd.f32 %v4511_v43, %v4546_v29 }
 0x3d3   :  { %v2098_v35 = vmax.f32 %v1952_v56, 0.0  ;;  %v1742_v43 = vadd.f32 %v4515_v46, %v4560_v57 }
 0x3d4   :  { %v2097_v54 = vmax.f32 %v1947_v17, 0.0  ;;  %v2876_v51 = vpop.f32.mrb[90].mxu1 }
 0x3d5   :  { %v1962_v24 = vadd.f32 %v2876_v51, %v1697_v63  ;;  %v1956_v27 = vpop.f32.mrb[91].mxu1 }
 0x3d6   :  { %v4608_v12 = vpack.c.bf16 %v2098_v35, %v2097_v54  ;;  %v1957_v22 = vadd.f32 %v1956_v27, %v1692_v60  ;;  %v4930_v27 = vld [vmem:[#allocation18_spill] sm:$0xff] }
 0x3d7   :  { %v2100_v40 = vmax.f32 %v1962_v24, 0.0 }
 0x3d8   :  { %v2099_v42 = vmax.f32 %v1957_v22, 0.0  ;;  %v2879_v52 = vpop.f32.mrb[92].mxu1  ;;  %v4931_v22 = vld [vmem:[#allocation5_spill] sm:$0xff] }
 0x3d9   :  { %v1972_v28 = vadd.f32 %v2879_v52, %v1707_v48  ;;  %v1966_v4 = vpop.f32.mrb[93].mxu1 }
 0x3da   :  { %v4614_v55 = vpack.c.bf16 %v2100_v40, %v2099_v42  ;;  %v1967_v26 = vadd.f32 %v1966_v4, %v1702_v10 }
 0x3db   :  { %v2102_v15 = vmax.f32 %v1972_v28, 0.0  ;;  %v1402_v28 = vpop.permute.xlu1 %1401 }
 0x3dc   :  { %v2101_v6 = vmax.f32 %v1967_v26, 0.0  ;;  %v2882_v32 = vpop.f32.mrb[94].mxu1 }
 0x3dd   :  { %v1982_v45 = vadd.f32 %v2882_v32, %v1717_v11  ;;  %v1976_v31 = vpop.f32.mrb[95].mxu1  ;;  %v1397_v11 = vpop.permute.xlu0 %1396  ;;  %v4934_v32 = vld [vmem:[#allocation9_spill] sm:$0xff] }
 0x3de   :  { %v3113_v1 = vpack.c.bf16 %v2102_v15, %v2101_v6  ;;  %v1977_v30 = vadd.f32 %v1976_v31, %v1712_v14 }
 0x3df   :  { %v2104_v7 = vmax.f32 %v1982_v45, 0.0  ;;  %v1777_v45 = vadd.f32 %v4934_v32, %v4595_v2 }
 0x3e0   :  { %v2103_v8 = vmax.f32 %v1977_v30, 0.0  ;;  %v2885_v56 = vpop.f32.mrb[96].mxu1  ;;  %3114 = vmatprep.subr.bf16.mxu1 %v3113_v1 }
 0x3e1   :  { %v1992_v36 = vadd.f32 %v2885_v56, %v1727_v47  ;;  %v1986_v58 = vpop.f32.mrb[97].mxu1  ;;  %3116 = vmatpush3.bf16.msra.mxu1 %v4576_v44  ;;  %v1747_v44 = vadd.f32 %v4519_v49, %v4556_v50  ;;  %v1752_v49 = vadd.f32 %v4931_v22, %v4930_v27  ;;  %v4941_v22 = vld [vmem:[#allocation14_spill] sm:$0xff] }
 0x3e2   :  { %v3117_v34 = vpack.c.bf16 %v2104_v7, %v2103_v8  ;;  %v1987_v62 = vadd.f32 %v1986_v58, %v1722_v20  ;;  %v1412_v20 = vpop.permute.xlu1 %1411 }
 0x3e3   :  { %v2106_v37 = vmax.f32 %v1992_v36, 0.0  ;;  %v4936_v36 = vld [vmem:[#allocation11_spill] sm:$0xff] }
 0x3e4   :  { %v2105_v9 = vmax.f32 %v1987_v62, 0.0  ;;  %v2888_v17 = vpop.f32.mrb[98].mxu1  ;;  %3118 = vmatprep.subr.bf16.mxu1 %v3117_v34  ;;  %v1787_v58 = vadd.f32 %v4936_v36, %v1402_v28  ;;  %v4937_v62 = vld [vmem:[#allocation10_spill] sm:$0xff]  ;;  %v4942_v28 = vld [vmem:[#allocation17_spill] sm:$0xff]  ;;  %v2147_v36 = vld [vmem:[%s4913_s5 + $0xb0] sm:$0xff] }
 0x3e5   :  { %v2002_v38 = vadd.f32 %v2888_v17, %v1737_v21  ;;  %v1996_v13 = vpop.f32.mrb[99].mxu1  ;;  %3120 = vmatpush3.bf16.msra.mxu1 %v4584_v5  ;;  %v1757_v5 = vadd.f32 %v4528_v59, %v4566_v39  ;;  %v4933_v59 = vld [vmem:[#allocation6_spill] sm:$0xff]  ;;  %v1782_v2 = vadd.f32 %v4937_v62, %v1397_v11  ;;  %v2149_v62 = vld [vmem:[%s4913_s5 + $0xc0] sm:$0xff] }
 0x3e6   :  { %v3121_v23 = vpack.c.bf16 %v2106_v37, %v2105_v9  ;;  %v1997_v63 = vadd.f32 %v1996_v13, %v1732_v0  ;;  %v1762_v39 = vadd.f32 %v4933_v59, %v4582_v61 }
 0x3e7   :  { %v2108_v35 = vmax.f32 %v2002_v38, 0.0  ;;  %v4938_v38 = vld [vmem:[#allocation13_spill] sm:$0xff] }
 0x3e8   :  { %v2107_v29 = vmax.f32 %v1997_v63, 0.0  ;;  %v2891_v60 = vpop.f32.mrb[100].mxu1  ;;  %3122 = vmatprep.subr.bf16.mxu1 %v3121_v23  ;;  %v1422_v23 = vpop.permute.xlu1 %1421  ;;  %v4939_v63 = vld [vmem:[#allocation12_spill] sm:$0xff] }
 0x3e9   :  { %v2012_v41 = vadd.f32 %v2891_v60, %v1747_v44  ;;  %v2006_v33 = vpop.f32.mrb[101].mxu1  ;;  %3124 = vmatpush3.bf16.msra.mxu1 %v4588_v3  ;;  %v4932_v3 = vld [vmem:[#allocation7_spill] sm:$0xff] }
 0x3ea   :  { %v3125_v54 = vpack.c.bf16 %v2108_v35, %v2107_v29  ;;  %v2007_v51 = vadd.f32 %v2006_v33, %v1742_v43  ;;  %v1767_v42 = vadd.f32 %v4932_v3, %v4579_v53  ;;  %v4935_v53 = vld [vmem:[#allocation8_spill] sm:$0xff] }
 0x3eb   :  { %v2110_v24 = vmax.f32 %v2012_v41, 0.0  ;;  %v1772_v1 = vadd.f32 %v4935_v53, %v4598_v16 }
 0x3ec   :  { %v2109_v50 = vmax.f32 %v2007_v51, 0.0  ;;  %v2894_v48 = vpop.f32.mrb[102].mxu1  ;;  %3126 = vmatprep.subr.bf16.mxu1 %v3125_v54  ;;  %v2129_v51 = vld [vmem:[%s4913_s5 + $0x20] sm:$0xff] }
 0x3ed   :  { %v2022_v46 = vadd.f32 %v2894_v48, %v1757_v5  ;;  %v2016_v57 = vpop.f32.mrb[103].mxu1  ;;  %3128 = vmatpush3.bf16.msra.mxu1 %v4592_v25  ;;  %v4940_v5 = vld [vmem:[#allocation15_spill] sm:$0xff] }
 0x3ee   :  { %v3129_v40 = vpack.c.bf16 %v2110_v24, %v2109_v50  ;;  %v2017_v10 = vadd.f32 %v2016_v57, %v1752_v49  ;;  %v1807_v24 = vadd.f32 %v4940_v5, %v1422_v23  ;;  %v2128_v57 = vld [vmem:[%s4913_s5 + $0x18] sm:$0xff]  ;;  %v2151_v5 = vld [vmem:[%s4913_s5 + $0xd0] sm:$0xff] }
 0x3ef   :  { %v2112_v52 = vmax.f32 %v2022_v46, 0.0  ;;  %v2168_v23 = vld [vmem:[%s4913_s5 + $0x158] sm:$0xff] }
 0x3f0   :  { %v2111_v4 = vmax.f32 %v2017_v10, 0.0  ;;  %v2897_v26 = vpop.f32.mrb[104].mxu1  ;;  %3130 = vmatprep.subr.bf16.mxu1 %v3129_v40  ;;  %v1432_v40 = vpop.permute.xlu1 %1431 }
 0x3f1   :  { %v2032_v15 = vadd.f32 %v2897_v26, %v1767_v42  ;;  %v2026_v14 = vpop.f32.mrb[105].mxu1  ;;  %3132 = vmatpush3.bf16.msra.mxu1 %v4600_v19  ;;  %v1407_v19 = vpop.permute.xlu0 %1406  ;;  %v2132_v42 = vld [vmem:[%s4913_s5 + $0x38] sm:$0xff]  ;;  %v1817_v59 = vadd.f32 %v4942_v28, %v1432_v40 }
 0x3f2   :  { %v3133_v6 = vpack.c.bf16 %v2112_v52, %v2111_v4  ;;  %v2027_v25 = vadd.f32 %v2026_v14, %v1762_v39  ;;  %v1792_v44 = vadd.f32 %v4939_v63, %v1407_v19  ;;  %v4943_v4 = vld [vmem:[#allocation16_spill] sm:$0xff]  ;;  %v2143_v19 = vld [vmem:[%s4913_s5 + $0x90] sm:$0xff] }
 0x3f3   :  { %v2114_v31 = vmax.f32 %v2032_v15, 0.0  ;;  %v2167_v63 = vld [vmem:[%s4913_s5 + $0x150] sm:$0xff] }
 0x3f4   :  { %v2113_v30 = vmax.f32 %v2027_v25, 0.0  ;;  %v2900_v47 = vpop.f32.mrb[106].mxu1  ;;  %3134 = vmatprep.subr.bf16.mxu1 %v3133_v6  ;;  %v2131_v25 = vld [vmem:[%s4913_s5 + $0x30] sm:$0xff] }
 0x3f5   :  { %v2042_v61 = vadd.f32 %v2900_v47, %v1777_v45  ;;  %v2036_v7 = vpop.f32.mrb[107].mxu1  ;;  %3136 = vmatpush3.bf16.msra.mxu1 %v4604_v18  ;;  %v1797_v18 = vadd.f32 %v4938_v38, %v1412_v20  ;;  %v1417_v29 = vpop.permute.xlu0 %1416  ;;  %v2141_v20 = vld [vmem:[%s4913_s5 + $0x80] sm:$0xff] }
 0x3f6   :  { %v3137_v8 = vpack.c.bf16 %v2114_v31, %v2113_v30  ;;  %v2037_v56 = vadd.f32 %v2036_v7, %v1772_v1  ;;  %v1802_v49 = vadd.f32 %v4941_v22, %v1417_v29  ;;  %v2135_v31 = vld [vmem:[%s4913_s5 + $0x50] sm:$0xff]  ;;  %v2134_v30 = vld [vmem:[%s4913_s5 + $0x48] sm:$0xff]  ;;  %v2137_v7 = vld [vmem:[%s4913_s5 + $0x60] sm:$0xff] }
 0x3f7   :  { %v2116_v34 = vmax.f32 %v2042_v61, 0.0  ;;  %v2138_v61 = vld [vmem:[%s4913_s5 + $0x68] sm:$0xff]  ;;  %v2161_v38 = vld [vmem:[%s4913_s5 + $0x120] sm:$0xff]  ;;  %v2160_v22 = vld [vmem:[%s4913_s5 + $0x118] sm:$0xff] }
 0x3f8   :  { %v2115_v21 = vmax.f32 %v2037_v56, 0.0  ;;  %v2903_v37 = vpop.f32.mrb[108].mxu1  ;;  %3138 = vmatprep.subr.bf16.mxu1 %v3137_v8  ;;  %v2140_v8 = vld [vmem:[%s4913_s5 + $0x78] sm:$0xff]  ;;  %v2130_v29 = vld [vmem:[%s4913_s5 + $0x28] sm:$0xff] }
 0x3f9   :  { %v2052_v16 = vadd.f32 %v2903_v37, %v1787_v58  ;;  %v2046_v0 = vpop.f32.mrb[109].mxu1  ;;  %3140 = vmatpush3.bf16.msra.mxu1 %v4608_v12  ;;  %v2125_v12 = vld [vmem:[%s4913_s5] sm:$0xff]  ;;  %v1427_v52 = vpop.permute.xlu0 %1426  ;;  %v2144_v56 = vld [vmem:[%s4913_s5 + $0x98] sm:$0xff]  ;;  %v2146_v58 = vld [vmem:[%s4913_s5 + $0xa8] sm:$0xff] }
 0x3fa   :  { %v3141_v9 = vpack.c.bf16 %v2116_v34, %v2115_v21  ;;  %v2047_v17 = vadd.f32 %v2046_v0, %v1782_v2  ;;  %v1812_v26 = vadd.f32 %v4943_v4, %v1427_v52  ;;  %v2150_v34 = vld [vmem:[%s4913_s5 + $0xc8] sm:$0xff]  ;;  %v2153_v2 = vld [vmem:[%s4913_s5 + $0xe0] sm:$0xff]  ;;  %v2152_v21 = vld [vmem:[%s4913_s5 + $0xd8] sm:$0xff] }
 0x3fb   :  { %v2118_v13 = vmax.f32 %v2052_v16, 0.0  ;;  %v2156_v37 = vld [vmem:[%s4913_s5 + $0xf8] sm:$0xff]  ;;  %v2155_v16 = vld [vmem:[%s4913_s5 + $0xf0] sm:$0xff] }
 0x3fc   :  { %v2117_v35 = vmax.f32 %v2047_v17, 0.0  ;;  %v2906_v43 = vpop.f32.mrb[110].mxu1  ;;  %3142 = vmatprep.subr.bf16.mxu1 %v3141_v9  ;;  %v2159_v0 = vld [vmem:[%s4913_s5 + $0x110] sm:$0xff]  ;;  %v2158_v9 = vld [vmem:[%s4913_s5 + $0x108] sm:$0xff] }
 0x3fd   :  { %v2062_v60 = vadd.f32 %v2906_v43, %v1797_v18  ;;  %v2056_v41 = vpop.f32.mrb[111].mxu1  ;;  %3144 = vmatpush3.bf16.msra.mxu1 %v4614_v55  ;;  %v2162_v17 = vld [vmem:[%s4913_s5 + $0x128] sm:$0xff]  ;;  %v2165_v18 = vld [vmem:[%s4913_s5 + $0x140] sm:$0xff]  ;;  %v2127_v43 = vld [vmem:[%s4913_s5 + $0x10] sm:$0xff] }
 0x3fe   :  { %v3145_v33 = vpack.c.bf16 %v2118_v13, %v2117_v35  ;;  %v2057_v54 = vadd.f32 %v2056_v41, %v1792_v44  ;;  %v2164_v13 = vld [vmem:[%s4913_s5 + $0x138] sm:$0xff]  ;;  %v2171_v44 = vld [vmem:[%s4913_s5 + $0x170] sm:$0xff]  ;;  %v2170_v35 = vld [vmem:[%s4913_s5 + $0x168] sm:$0xff] }
 0x3ff   :  { %v2120_v27 = vmax.f32 %v2062_v60, 0.0  ;;  %v2133_v60 = vld [vmem:[%s4913_s5 + $0x40] sm:$0xff]  ;;  %v2136_v41 = vld [vmem:[%s4913_s5 + $0x58] sm:$0xff] }
 0x400   :  { %v2119_v50 = vmax.f32 %v2057_v54, 0.0  ;;  %v2909_v48 = vpop.f32.mrb[112].mxu1  ;;  %2382 = vmatmul.mubr.f32.vlgmr.msra.gmra.mrb[116].mxu1 %v2125_v12  ;;  %3146 = vmatprep.subr.bf16.mxu1 %v3145_v33  ;;  %v2139_v12 = vld [vmem:[%s4913_s5 + $0x70] sm:$0xff]  ;;  %v2145_v54 = vld [vmem:[%s4913_s5 + $0xa0] sm:$0xff] }
 0x401   :  { %v2072_v55 = vadd.f32 %v2909_v48, %v1807_v24  ;;  %v2066_v46 = vpop.f32.mrb[113].mxu1  ;;  %3148 = vmatpush3.bf16.msra.mxu1 %v3145_v33  ;;  %2386 = vmatprep.mubr.f32.mxu1 %v2129_v51  ;;  %v2142_v33 = vld [vmem:[%s4913_s5 + $0x88] sm:$0xff]  ;;  %v2148_v51 = vld [vmem:[%s4913_s5 + $0xb8] sm:$0xff]  ;;  %v2169_v48 = vld [vmem:[%s4913_s5 + $0x160] sm:$0xff] }
 0x402   :  { %v3149_v10 = vpack.c.bf16 %v2120_v27, %v2119_v50  ;;  %v2067_v3 = vadd.f32 %v2066_v46, %v1802_v49  ;;  %v2154_v24 = vld [vmem:[%s4913_s5 + $0xe8] sm:$0xff]  ;;  %v2157_v27 = vld [vmem:[%s4913_s5 + $0x100] sm:$0xff]  ;;  %v2163_v49 = vld [vmem:[%s4913_s5 + $0x130] sm:$0xff] }
 0x403   :  { %v2122_v39 = vmax.f32 %v2072_v55, 0.0  ;;  %v2166_v50 = vld [vmem:[%s4913_s5 + $0x148] sm:$0xff]  ;;  %v2172_v55 = vld [vmem:[%s4913_s5 + $0x178] sm:$0xff] }
 0x404   :  { %v2121_v11 = vmax.f32 %v2067_v3, 0.0  ;;  %v2912_v15 = vpop.f32.mrb[114].mxu1  ;;  %2387 = vmatmul.mubr.f32.gmra.mrb[118].mxu1 %v2128_v57  ;;  %3150 = vmatprep.subr.bf16.mxu1 %v3149_v10 }
 0x405   :  { %v2082_v14 = vadd.f32 %v2912_v15, %v1817_v59  ;;  %v2076_v6 = vpop.f32.mrb[115].mxu1  ;;  %3152 = vmatpush3.bf16.msra.mxu1 %v3149_v10  ;;  %2391 = vmatprep.mubr.f32.mxu1 %v2132_v42 }
 0x406   :  { %v3153_v32 = vpack.c.bf16 %v2122_v39, %v2121_v11  ;;  %v2077_v45 = vadd.f32 %v2076_v6, %v1812_v26 }
 0x407   :  { %v2124_v53 = vmax.f32 %v2082_v14, 0.0 }
 0x408   :  { %v2123_v1 = vmax.f32 %v2077_v45, 0.0  ;;  %2392 = vmatmul.mubr.f32.gmra.mrb[120].mxu1 %v2131_v25  ;;  %3154 = vmatprep.subr.bf16.mxu1 %v3153_v32 }
 0x409   :  { %3156 = vmatpush3.bf16.msra.mxu1 %v3153_v32  ;;  %2396 = vmatprep.mubr.f32.mxu1 %v2135_v31 }
 0x40a   :  { %v3157_v47 = vpack.c.bf16 %v2124_v53, %v2123_v1 }
 0x40c   :  { %2397 = vmatmul.mubr.f32.gmra.mrb[122].mxu1 %v2134_v30  ;;  %3158 = vmatprep.subr.bf16.mxu1 %v3157_v47 }
 0x40d   :  { %3160 = vmatpush3.bf16.msra.mxu1 %v3157_v47  ;;  %2401 = vmatprep.mubr.f32.mxu1 %v2138_v61 }
 0x410   :  { %2402 = vmatmul.mubr.f32.gmra.mrb[124].mxu1 %v2137_v7 }
 0x411   :  { %2406 = vmatprep.mubr.f32.mxu1 %v2141_v20 }
 0x414   :  { %2407 = vmatmul.mubr.f32.gmra.mrb[126].mxu1 %v2140_v8 }
 0x415   :  { %2411 = vmatprep.mubr.f32.mxu1 %v2144_v56 }
 0x418   :  { %2412 = vmatmul.mubr.f32.gmra.mrb[128].mxu1 %v2143_v19 }
 0x419   :  { %2416 = vmatprep.mubr.f32.mxu1 %v2147_v36 }
 0x41c   :  { %2417 = vmatmul.mubr.f32.gmra.mrb[130].mxu1 %v2146_v58 }
 0x41d   :  { %2421 = vmatprep.mubr.f32.mxu1 %v2150_v34 }
 0x420   :  { %2422 = vmatmul.mubr.f32.gmra.mrb[132].mxu1 %v2149_v62 }
 0x421   :  { %2426 = vmatprep.mubr.f32.mxu1 %v2153_v2 }
 0x424   :  { %2427 = vmatmul.mubr.f32.gmra.mrb[134].mxu1 %v2152_v21 }
 0x425   :  { %2431 = vmatprep.mubr.f32.mxu1 %v2156_v37  ;;  %v2197_v37 = vpop.permute.xlu1 %2196 }
 0x428   :  { %2432 = vmatmul.mubr.f32.gmra.mrb[136].mxu1 %v2155_v16 }
 0x429   :  { %2436 = vmatprep.mubr.f32.mxu1 %v2159_v0  ;;  %v2192_v0 = vpop.permute.xlu0 %2191 }
 0x42c   :  { %2437 = vmatmul.mubr.f32.gmra.mrb[138].mxu1 %v2158_v9 }
 0x42d   :  { %2441 = vmatprep.mubr.f32.mxu1 %v2162_v17 }
 0x430   :  { %2442 = vmatmul.mubr.f32.gmra.mrb[140].mxu1 %v2161_v38 }
 0x431   :  { %2446 = vmatprep.mubr.f32.mxu1 %v2165_v18 }
 0x434   :  { %2447 = vmatmul.mubr.f32.gmra.mrb[142].mxu1 %v2164_v13  ;;  %v2207_v13 = vpop.permute.xlu1 %2206 }
 0x435   :  { %2451 = vmatprep.mubr.f32.mxu1 %v2168_v23 }
 0x438   :  { %2452 = vmatmul.mubr.f32.gmra.mrb[144].mxu1 %v2167_v63  ;;  %v2202_v63 = vpop.permute.xlu0 %2201 }
 0x439   :  { %2456 = vmatprep.mubr.f32.mxu1 %v2171_v44 }
 0x43c   :  { %2457 = vmatmul.mubr.f32.gmra.mrb[146].mxu1 %v2170_v35 }
 0x43d   :  { %2929 = vmatprep.mubr.msk.f32.mxu1 %vm1434_vm0, %v2127_v43 }
 0x440   :  { %2930 = vmatmul.mubr.msk.f32.vlgmr.msra.gmra.mrb[148].mxu1 %vm1434_vm0, %v2130_v29  ;;  %v2217_v29 = vpop.permute.xlu1 %2216 }
 0x441   :  { %2932 = vmatprep.mubr.msk.f32.mxu1 %vm1434_vm0, %v2133_v60 }
 0x444   :  { %2933 = vmatmul.mubr.msk.f32.gmra.mrb[150].mxu1 %vm1434_vm0, %v2136_v41  ;;  %v2212_v41 = vpop.permute.xlu0 %2211 }
 0x445   :  { %2935 = vmatprep.mubr.msk.f32.mxu1 %vm1434_vm0, %v2139_v12 }
 0x448   :  { %2936 = vmatmul.mubr.msk.f32.gmra.mrb[152].mxu1 %vm1434_vm0, %v2142_v33 }
 0x449   :  { %2938 = vmatprep.mubr.msk.f32.mxu1 %vm1434_vm0, %v2145_v54 }
 0x44c   :  { %2939 = vmatmul.mubr.msk.f32.gmra.mrb[154].mxu1 %vm1434_vm0, %v2148_v51 }
 0x44d   :  { %2941 = vmatprep.mubr.msk.f32.mxu1 %vm1434_vm0, %v2151_v5 }
 0x450   :  { %2942 = vmatmul.mubr.msk.f32.gmra.mrb[156].mxu1 %vm1434_vm0, %v2154_v24 }
 0x451   :  { %2944 = vmatprep.mubr.msk.f32.mxu1 %vm1434_vm0, %v2157_v27 }
 0x454   :  { %2945 = vmatmul.mubr.msk.f32.gmra.mrb[158].mxu1 %vm1434_vm0, %v2160_v22  ;;  %v2227_v22 = vpop.permute.xlu1 %2226 }
 0x455   :  { %2947 = vmatprep.mubr.msk.f32.mxu1 %vm1434_vm0, %v2163_v49 }
 0x458   :  { %2948 = vmatmul.mubr.msk.f32.gmra.mrb[160].mxu1 %vm1434_vm0, %v2166_v50  ;;  %v2222_v50 = vpop.permute.xlu0 %2221 }
 0x459   :  { %2950 = vmatprep.mubr.msk.f32.mxu1 %vm1434_vm0, %v2169_v48 }
 0x45c   :  { %2951 = vmatmul.mubr.msk.f32.gmra.mrb[162].mxu1 %vm1434_vm0, %v2172_v55 }
 0x4d3   :  { %v2765_v46 = vpop.f32.mrb[116].mxu1 }
 0x4d4   :  { %v2766_v57 = vpop.f32.mrb[117].mxu1 }
 0x4d5   :  { %v2767_v40 = vadd.f32 %v2766_v57, %v2765_v46 }
 0x4d7   :  { %v2768_v10 = vpop.f32.mrb[118].mxu1  ;;  %v2384_v5 = vadd.f32 %v2767_v40, %v2192_v0 }
 0x4d8   :  { %v2769_v3 = vpop.f32.mrb[119].mxu1 }
 0x4d9   :  { %v2770_v42 = vadd.f32 %v2769_v3, %v2768_v10 }
 0x4db   :  { %v2771_v52 = vpop.f32.mrb[120].mxu1  ;;  %v2389_v54 = vadd.f32 %v2770_v42, %v2197_v37  ;;  %v2237_v42 = vpop.permute.xlu1 %2236 }
 0x4dc   :  { %v2772_v28 = vpop.f32.mrb[121].mxu1 }
 0x4dd   :  { %v2773_v59 = vadd.f32 %v2772_v28, %v2771_v52 }
 0x4df   :  { %v2774_v39 = vpop.f32.mrb[122].mxu1  ;;  %v2394_v46 = vadd.f32 %v2773_v59, %v2202_v63 }
 0x4e0   :  { %v2775_v4 = vpop.f32.mrb[123].mxu1 }
 0x4e1   :  { %v2776_v26 = vadd.f32 %v2775_v4, %v2774_v39  ;;  %v2232_v39 = vpop.permute.xlu0 %2231 }
 0x4e3   :  { %v2777_v11 = vpop.f32.mrb[124].mxu1  ;;  %v2399_v48 = vadd.f32 %v2776_v26, %v2207_v13 }
 0x4e4   :  { %v2778_v15 = vpop.f32.mrb[125].mxu1 }
 0x4e5   :  { %v2779_v14 = vadd.f32 %v2778_v15, %v2777_v11 }
 0x4e7   :  { %v2780_v6 = vpop.f32.mrb[126].mxu1  ;;  %v2404_v28 = vadd.f32 %v2779_v14, %v2212_v41 }
 0x4e8   :  { %v2781_v25 = vpop.f32.mrb[127].mxu1 }
 0x4e9   :  { %v2782_v32 = vadd.f32 %v2781_v25, %v2780_v6 }
 0x4eb   :  { %v2783_v45 = vpop.f32.mrb[128].mxu1  ;;  %v2409_v3 = vadd.f32 %v2782_v32, %v2217_v29  ;;  %v2247_v32 = vpop.permute.xlu1 %2246 }
 0x4ec   :  { %v2784_v31 = vpop.f32.mrb[129].mxu1 }
 0x4ed   :  { %v4817_v53 = vadd.f32 %v2784_v31, %v2783_v45  ;;  %v2242_v31 = vpop.permute.xlu0 %2241 }
 0x4ef   :  { %v2786_v1 = vpop.f32.mrb[130].mxu1  ;;  %v2414_v6 = vadd.f32 %v4817_v53, %v2222_v50 }
 0x4f0   :  { %v2787_v30 = vpop.f32.mrb[131].mxu1 }
 0x4f1   :  { %v2788_v47 = vadd.f32 %v2787_v30, %v2786_v1 }
 0x4f3   :  { %v2789_v61 = vpop.f32.mrb[132].mxu1  ;;  %v2419_v11 = vadd.f32 %v2788_v47, %v2227_v22 }
 0x4f4   :  { %v2790_v7 = vpop.f32.mrb[133].mxu1 }
 0x4f5   :  { %v4819_v20 = vadd.f32 %v2790_v7, %v2789_v61 }
 0x4f7   :  { %v2792_v8 = vpop.f32.mrb[134].mxu1  ;;  %v2424_v53 = vadd.f32 %v4819_v20, %v2232_v39  ;;  %v2252_v20 = vpop.permute.xlu0 %2251 }
 0x4f8   :  { %v2793_v56 = vpop.f32.mrb[135].mxu1 }
 0x4f9   :  { %v4821_v19 = vadd.f32 %v2793_v56, %v2792_v8  ;;  %v2257_v56 = vpop.permute.xlu1 %2256 }
 0x4fb   :  { %v2795_v36 = vpop.f32.mrb[136].mxu1  ;;  %v2429_v1 = vadd.f32 %v4821_v19, %v2237_v42 }
 0x4fc   :  { %v2796_v58 = vpop.f32.mrb[137].mxu1 }
 0x4fd   :  { %v4823_v34 = vadd.f32 %v2796_v58, %v2795_v36 }
 0x4ff   :  { %v2798_v62 = vpop.f32.mrb[138].mxu1  ;;  %v2434_v36 = vadd.f32 %v4823_v34, %v2242_v31 }
 0x500   :  { %v2799_v2 = vpop.f32.mrb[139].mxu1 }
 0x501   :  { %v4825_v21 = vadd.f32 %v2799_v2, %v2798_v62 }
 0x503   :  { %v2801_v16 = vpop.f32.mrb[140].mxu1  ;;  %v2439_v8 = vadd.f32 %v4825_v21, %v2247_v32 }
 0x504   :  { %v2802_v9 = vpop.f32.mrb[141].mxu1 }
 0x505   :  { %v4827_v17 = vadd.f32 %v2802_v9, %v2801_v16  ;;  %v2267_v9 = vpop.permute.xlu1 %2266 }
 0x507   :  { %v2804_v38 = vpop.f32.mrb[142].mxu1  ;;  %v2444_v16 = vadd.f32 %v4827_v17, %v2252_v20 }
 0x508   :  { %v2805_v18 = vpop.f32.mrb[143].mxu1 }
 0x509   :  { %v4829_v23 = vadd.f32 %v2805_v18, %v2804_v38  ;;  %v2262_v18 = vpop.permute.xlu0 %2261 }
 0x50b   :  { %v2807_v44 = vpop.f32.mrb[144].mxu1  ;;  %v2449_v21 = vadd.f32 %v4829_v23, %v2257_v56 }
 0x50c   :  { %v2808_v35 = vpop.f32.mrb[145].mxu1 }
 0x50d   :  { %v4831_v43 = vadd.f32 %v2808_v35, %v2807_v44 }
 0x50f   :  { %v2810_v60 = vpop.f32.mrb[146].mxu1  ;;  %v2454_v17 = vadd.f32 %v4831_v43, %v2262_v18 }
 0x510   :  { %v2811_v12 = vpop.f32.mrb[147].mxu1 }
 0x511   :  { %v4833_v33 = vadd.f32 %v2811_v12, %v2810_v60 }
 0x513   :  { %v2931_v51 = vpop.f32.mrb[148].mxu1  ;;  %v2459_v13 = vadd.f32 %v4833_v33, %v2267_v9 }
 0x514   :  { %v2534_v24 = vadd.f32 %v2931_v51, %v2389_v54  ;;  %v2528_v27 = vpop.f32.mrb[149].mxu1 }
 0x515   :  { %v2529_v49 = vadd.f32 %v2528_v27, %v2384_v5 }
 0x516   :  { %2609 = vst.msk [vmem:[%s4915_s7 + $0x8] sm:$0xff] %vm2607_vm1, %v2534_v24 }
 0x517   :  { %2608 = vst.msk [vmem:[%s4915_s7] sm:$0xff] %vm2607_vm1, %v2529_v49  ;;  %v2934_v55 = vpop.f32.mrb[150].mxu1 }
 0x518   :  { %v2544_v57 = vadd.f32 %v2934_v55, %v2399_v48  ;;  %v2538_v40 = vpop.f32.mrb[151].mxu1 }
 0x519   :  { %v2539_v10 = vadd.f32 %v2538_v40, %v2394_v46 }
 0x51a   :  { %2611 = vst.msk [vmem:[%s4915_s7 + $0x18] sm:$0xff] %vm2607_vm1, %v2544_v57 }
 0x51b   :  { %2610 = vst.msk [vmem:[%s4915_s7 + $0x10] sm:$0xff] %vm2607_vm1, %v2539_v10  ;;  %v2937_v52 = vpop.f32.mrb[152].mxu1 }
 0x51c   :  { %v2554_v4 = vadd.f32 %v2937_v52, %v2409_v3  ;;  %v2548_v59 = vpop.f32.mrb[153].mxu1 }
 0x51d   :  { %v2549_v26 = vadd.f32 %v2548_v59, %v2404_v28 }
 0x51e   :  { %2613 = vst.msk [vmem:[%s4915_s7 + $0x28] sm:$0xff] %vm2607_vm1, %v2554_v4 }
 0x51f   :  { %2612 = vst.msk [vmem:[%s4915_s7 + $0x20] sm:$0xff] %vm2607_vm1, %v2549_v26  ;;  %v2940_v15 = vpop.f32.mrb[154].mxu1 }
 0x520   :  { %v2564_v25 = vadd.f32 %v2940_v15, %v2419_v11  ;;  %v2558_v14 = vpop.f32.mrb[155].mxu1 }
 0x521   :  { %v2559_v45 = vadd.f32 %v2558_v14, %v2414_v6 }
 0x522   :  { %2615 = vst.msk [vmem:[%s4915_s7 + $0x38] sm:$0xff] %vm2607_vm1, %v2564_v25 }
 0x523   :  { %2614 = vst.msk [vmem:[%s4915_s7 + $0x30] sm:$0xff] %vm2607_vm1, %v2559_v45  ;;  %v2943_v30 = vpop.f32.mrb[156].mxu1 }
 0x524   :  { %v2574_v47 = vadd.f32 %v2943_v30, %v2429_v1  ;;  %v2568_v61 = vpop.f32.mrb[157].mxu1 }
 0x525   :  { %v2569_v7 = vadd.f32 %v2568_v61, %v2424_v53 }
 0x526   :  { %2617 = vst.msk [vmem:[%s4915_s7 + $0x48] sm:$0xff] %vm2607_vm1, %v2574_v47 }
 0x527   :  { %2616 = vst.msk [vmem:[%s4915_s7 + $0x40] sm:$0xff] %vm2607_vm1, %v2569_v7  ;;  %v2946_v19 = vpop.f32.mrb[158].mxu1 }
 0x528   :  { %v2584_v58 = vadd.f32 %v2946_v19, %v2439_v8  ;;  %v2578_v62 = vpop.f32.mrb[159].mxu1 }
 0x529   :  { %v2579_v2 = vadd.f32 %v2578_v62, %v2434_v36 }
 0x52a   :  { %2619 = vst.msk [vmem:[%s4915_s7 + $0x58] sm:$0xff] %vm2607_vm1, %v2584_v58 }
 0x52b   :  { %2618 = vst.msk [vmem:[%s4915_s7 + $0x50] sm:$0xff] %vm2607_vm1, %v2579_v2  ;;  %v2949_v37 = vpop.f32.mrb[160].mxu1 }
 0x52c   :  { %v2594_v34 = vadd.f32 %v2949_v37, %v2449_v21  ;;  %v2588_v0 = vpop.f32.mrb[161].mxu1 }
 0x52d   :  { %v2589_v38 = vadd.f32 %v2588_v0, %v2444_v16 }
 0x52e   :  { %2621 = vst.msk [vmem:[%s4915_s7 + $0x68] sm:$0xff] %vm2607_vm1, %v2594_v34 }
 0x52f   :  { %2620 = vst.msk [vmem:[%s4915_s7 + $0x60] sm:$0xff] %vm2607_vm1, %v2589_v38  ;;  %v2952_v23 = vpop.f32.mrb[162].mxu1 }
 0x530   :  { %v2604_v63 = vadd.f32 %v2952_v23, %v2459_v13  ;;  %v2598_v44 = vpop.f32.mrb[163].mxu1 }
 0x531   :  { %v2599_v35 = vadd.f32 %v2598_v44, %v2454_v17 }
 0x532   :  { %2623 = vst.msk [vmem:[%s4915_s7 + $0x78] sm:$0xff] %vm2607_vm1, %v2604_v63 }
 0x533   :  { %2622 = vst.msk [vmem:[%s4915_s7 + $0x70] sm:$0xff] %vm2607_vm1, %v2599_v35 }
 0x534   :  { %2628 = vsyncpa [#allocation3], 1 }

</bundles_post_ra>
